<compile_context>
chip_gen: v5e
topology: v5e:2x2
jax: 0.10.0
libtpu: 0.0.40
codegen_flags: <defaults>
</compile_context>

<pallas_src>
import jax
import jax.numpy as jnp
from jax.experimental import pallas as pl
from jax.experimental.pallas import tpu as pltpu


def _round_up(x, m):
    return ((x + m - 1) // m) * m


def _vmem_capacity_bytes():
    """Physical VMEM of the local TPU; conservative fallback if unavailable."""
    try:
        cap = getattr(pltpu.get_tpu_info(), "vmem_capacity_bytes", None)
        if cap:
            return int(cap)
    except Exception:
        pass
    return 64 << 20  # v7x per-TC VMEM (smallest current gen) -> safe everywhere


def _estimate_vmem(tm, ti, H, wb, ob):
    """Per-step VMEM footprint estimate (double-buffered pipeline)."""
    return (2 * tm * H * wb            # x tile (bf16, double-buffered)
            + 2 * tm * H * ob          # out tile (bf16, double-buffered)
            + tm * H * 4               # f32 accumulator scratch
            + 2 * H * (2 * ti) * wb    # fused [gate|up] weight tile, dbl-buf
            + 2 * ti * H * wb          # down weight tile, dbl-buf
            + 4 * tm * ti * 4)         # gu/gate/up/h f32 working values (margin)


def _ti_candidates(I, ti_cap):
    """I-tile widths: full-resident first, then multiples of 128 dividing I."""
    if I % 128 != 0:
        # TODO(synk): pad/mask a ragged intermediate dim instead of full-width.
        return [I]
    cands = [I] + [d for d in range(I - 128, 0, -128) if I % d == 0]
    if ti_cap is not None:
        capped = [d for d in cands if d <= ti_cap]
        cands = capped if capped else [cands[-1]]
    return cands


def _plan_tiles(H, I, tm_target, ti_cap, budget, wb, ob):
    """Pick (tm, ti) so the estimated working set fits the VMEM budget.

    Prefers the largest ti (ideally ti == I -> weights stay VMEM-resident
    across all M tiles, no per-M-tile weight re-streaming); only shrinks the
    row tile if even the smallest I tile does not fit.
    """
    tis = _ti_candidates(I, ti_cap)
    for ti in tis:
        if _estimate_vmem(tm_target, ti, H, wb, ob) <= budget:
            return tm_target, ti
    ti = tis[-1]
    tm = tm_target
    while tm > 16 and _estimate_vmem(tm, ti, H, wb, ob) > budget:
        tm = max(16, tm // 2)
    return tm, ti


def swiglu_kernel(x_ref, wgu_ref, wd_ref, o_ref, acc_ref):
    """One (tm rows) x (ti intermediate-cols) step of the fused SwiGLU FFN."""
    i = pl.program_id(1)

    @pl.when(i == 0)
    def _init():
        acc_ref[...] = jnp.zeros_like(acc_ref)

    x = x_ref[...]                                            # (tm, H) bf16
    # One fused MXU matmul for gate and up: wgu block i = [gate tile | up tile].
    gu = jnp.dot(x, wgu_ref[...], preferred_element_type=jnp.float32)
    ti = wd_ref.shape[0]
    gate = gu[:, :ti]
    up = gu[:, ti:]
    h = gate * jax.nn.sigmoid(gate) * up                      # silu(gate)*up, f32

    # Partial down-projection: SwiGLU is elementwise over I, so partial I tiles
    # contribute independent rank-ti updates that sum in the f32 accumulator.
    acc_ref[...] += jnp.dot(h.astype(wd_ref.dtype), wd_ref[...],
                            preferred_element_type=jnp.float32)

    @pl.when(i == pl.num_programs(1) - 1)
    def _finalize():
        o_ref[...] = acc_ref[...].astype(o_ref.dtype)


def make_swiglu_ffn(params, *, scaling, tm=256, ti=None,
                    compute_dtype=jnp.bfloat16, vmem_budget_bytes=None):
    """Build a fused SwiGLU-FFN forward fn.  LoRA merge + tile planning happen
    ONCE here, not per call.

    params (pre-transposed so every matmul is row-major (M,K)@(K,N)):
      wgT/wuT: (H, I), agT/auT: (H, r), bgT/buT: (r, I)
      wdT:     (I, H), adT:     (I, r), bdT:     (r, H)

    tm: target row tile (sweep {256, 512}; 512 helps v6e prefill if weights
        are not resident).  ti: optional cap on the I tile; None = auto
        (prefer fully resident weights when they fit VMEM).
    """
    wb = jnp.dtype(compute_dtype).itemsize
    ob = wb  # kernel output dtype == compute dtype

    # --- one-time LoRA merge (eval mode; LoRA dropout = identity) ------------
    # torch forward:  y = x @ W.T + scaling * (x @ A.T) @ B.T
    #               = x @ (W.T + scaling * (A.T @ B.T))
    # NOTE: for real checkpoints validate the bf16-merged weights against the
    # f32 unmerged reference — bf16 rounding can flush a tiny LoRA delta.
    def merge(wT, aT, bT):
        return (wT + scaling * (aT @ bT)).astype(compute_dtype)

    wg = merge(params["wgT"], params["agT"], params["bgT"])   # (H, I)
    wu = merge(params["wuT"], params["auT"], params["buT"])   # (H, I)
    wd = merge(params["wdT"], params["adT"], params["bdT"])   # (I, H)
    H, I = wg.shape

    budget = vmem_budget_bytes
    if budget is None:
        budget = max(_vmem_capacity_bytes() - (16 << 20), 8 << 20)

    tm_plan, ti_eff = _plan_tiles(H, I, max(tm, 16), ti, budget, wb, ob)
    n_i = I // ti_eff

    # Interleave gate/up column tiles so grid-block i of wgu is
    # [gate tile i | up tile i] -> one matmul per step, contiguous DMA.
    wgu = jnp.concatenate(
        [wg.reshape(H, n_i, ti_eff), wu.reshape(H, n_i, ti_eff)],
        axis=-1).reshape(H, 2 * I)

    # TODO(synk): on v5e, if xprof shows exposed weight-DMA waits, set
    # pipeline_mode=pl.Buffered(3) on the weight BlockSpecs (VMEM headroom
    # exists under 128 MiB).

    def forward(x):
        B, S, Hx = x.shape
        assert Hx == H, "hidden size mismatch"
        M = B * S

        m_align = 16 if wb == 2 else 8           # bf16 packs 16 rows / vreg
        tm_eff = min(tm_plan, _round_up(M, m_align))
        # Megacore: guarantee >= 2 row tiles when M can be split (v7x: 2 TCs).
        half = _round_up(-(-M // 2), m_align)
        if M >= 2 * m_align and tm_eff > half:
            tm_eff = half
        M_pad = _round_up(M, tm_eff)

        x2d = x.reshape(M, H).astype(compute_dtype)
        if M_pad != M:
            x2d = jnp.pad(x2d, ((0, M_pad - M), (0, 0)))

        grid = (M_pad // tm_eff, n_i)            # reduction (I) axis last

        vmem_limit = int(min(
            max(2 * _estimate_vmem(tm_eff, ti_eff, H, wb, ob), 16 << 20),
            budget))

        out2d = pl.pallas_call(
            swiglu_kernel,
            out_shape=jax.ShapeDtypeStruct((M_pad, H), compute_dtype),
            grid_spec=pltpu.PrefetchScalarGridSpec(
                num_scalar_prefetch=0,
                grid=grid,
                in_specs=[
                    pl.BlockSpec((tm_eff, H), lambda m, i: (m, 0)),      # x rows
                    pl.BlockSpec((H, 2 * ti_eff), lambda m, i: (0, i)),  # [g|u] W
                    pl.BlockSpec((ti_eff, H), lambda m, i: (i, 0)),      # down W
                ],
                out_specs=pl.BlockSpec((tm_eff, H), lambda m, i: (m, 0)),
                scratch_shapes=[pltpu.VMEM((tm_eff, H), jnp.float32)],
            ),
            compiler_params=pltpu.CompilerParams(
                dimension_semantics=("parallel", "arbitrary"),
                vmem_limit_bytes=vmem_limit),
        )(x2d, wgu, wd)

        return out2d[:M].astype(x.dtype).reshape(B, S, H)

    return forward


def reference(x, params, *, scaling):
    """Plain-JAX f32 reference mirroring the PyTorch forward (eval mode)."""
    B, S, H = x.shape
    x2d = x.reshape(B * S, H)

    def lora_lin(v, wT, aT, bT):
        return v @ wT + scaling * ((v @ aT) @ bT)

    gate = lora_lin(x2d, params["wgT"], params["agT"], params["bgT"])
    up = lora_lin(x2d, params["wuT"], params["auT"], params["buT"])
    gate = gate * jax.nn.sigmoid(gate)   # silu
    h = gate * up
    out = lora_lin(h, params["wdT"], params["adT"], params["bdT"])
    return out.reshape(B, S, H)


if __name__ == "__main__":
    # Small, kernel-friendly config (hidden/intermediate multiples of 128).
    batch, seq = 2, 8
    hidden, inter, rank, alpha = 256, 512, 16, 32
    scaling = alpha / rank

    key = jax.random.PRNGKey(0)
    ks = jax.random.split(key, 4)
    x = jax.random.normal(ks[0], (batch, seq, hidden), dtype=jnp.float32)

    # Deterministic parameter init (shapes follow LoRALinear.__init__).
    # lora_B is zero-initialized in the PyTorch module; small nonzero values
    # here so the LoRA path is actually exercised numerically.
    def lora_params(k, in_f, out_f, r):
        k1, k2, k3 = jax.random.split(k, 3)
        w = jax.random.normal(k1, (out_f, in_f), jnp.float32) * 0.02
        a = jax.random.normal(k2, (r, in_f), jnp.float32) * 0.02
        b = jax.random.normal(k3, (out_f, r), jnp.float32) * 0.02
        return w.T, a.T, b.T  # pre-transposed for the kernel

    wgT, agT, bgT = lora_params(ks[1], hidden, inter, rank)
    wuT, auT, buT = lora_params(ks[2], hidden, inter, rank)
    wdT, adT, bdT = lora_params(ks[3], inter, hidden, rank)

    params = dict(wgT=wgT, agT=agT, bgT=bgT,
                  wuT=wuT, auT=auT, buT=buT,
                  wdT=wdT, adT=adT, bdT=bdT)

    ref = reference(x, params, scaling=scaling)

    # 1) Auto plan: at these sizes the merged weights fit VMEM, so the planner
    #    keeps them fully resident (single I step, no per-M-tile re-stream).
    ffn_auto = make_swiglu_ffn(params, scaling=scaling)
    out_auto = jax.block_until_ready(ffn_auto(x))
    assert out_auto.shape == (batch, seq, hidden)
    # bf16 inputs/weights/output, f32 accumulation vs pure-f32 reference.
    assert jnp.allclose(out_auto, ref, atol=5e-3, rtol=3e-2), \
        "mismatch vs reference (resident-weight path)"

    # 2) Capped ti=256: forces two I-reduction steps so the accumulator
    #    init/finalize path is exercised too.
    ffn_tiled = make_swiglu_ffn(params, scaling=scaling, tm=256, ti=256)
    out_tiled = jax.block_until_ready(ffn_tiled(x))
    assert jnp.allclose(out_tiled, ref, atol=5e-3, rtol=3e-2), \
        "mismatch vs reference (tiled-I path)"

    print("KERNEL_OK")
</pallas_src>

<mosaic_0001>
module attributes {stable_mosaic.version = 11 : i64} {
  func.func @swiglu_kernel(%arg0: i32, %arg1: i32, %arg2: memref<16x256xbf16, #tpu.memory_space<vmem>>, %arg3: memref<256x1024xbf16, #tpu.memory_space<vmem>>, %arg4: memref<512x256xbf16, #tpu.memory_space<vmem>>, %arg5: memref<16x256xbf16, #tpu.memory_space<vmem>>, %arg6: memref<16x256xf32, #tpu.memory_space<vmem>>) attributes {dimension_semantics = [#tpu.dimension_semantics<parallel>, #tpu.dimension_semantics<arbitrary>], iteration_bounds = array<i64: 1, 1>, scalar_prefetch = 0 : i64, scratch_operands = 1 : i64, tpu.core_type = #tpu.core_type<tc>, window_params = [{transform_indices = @transform_0, window_bounds = array<i64: 16, 256>}, {transform_indices = @transform_1, window_bounds = array<i64: 256, 1024>}, {transform_indices = @transform_2, window_bounds = array<i64: 512, 256>}, {transform_indices = @transform_3, window_bounds = array<i64: 16, 256>}]} {
    %c0_i32 = arith.constant 0 : i32
    %0 = arith.cmpi eq, %arg1, %c0_i32 : i32
    %1 = arith.extui %0 : i1 to i32
    %c0_i32_0 = arith.constant 0 : i32
    %2 = arith.cmpi ne, %1, %c0_i32_0 : i32
    scf.if %2 {
      %cst_14 = arith.constant 0.000000e+00 : f32
      %24 = vector.broadcast %cst_14 : f32 to vector<16x256xf32>
      %c0_15 = arith.constant 0 : index
      %c0_16 = arith.constant 0 : index
      %25 = vector.load %arg6[%c0_15, %c0_16] : memref<16x256xf32, #tpu.memory_space<vmem>>, vector<16x256xf32>
      tpu.vector_store %arg6[%c0_15, %c0_16], %24 {strides = array<i32>} : memref<16x256xf32, #tpu.memory_space<vmem>>, vector<16x256xf32>,
    } else {
    }
    %c0 = arith.constant 0 : index
    %c0_1 = arith.constant 0 : index
    %3 = vector.load %arg2[%c0, %c0_1] : memref<16x256xbf16, #tpu.memory_space<vmem>>, vector<16x256xbf16>
    %c0_2 = arith.constant 0 : index
    %c0_3 = arith.constant 0 : index
    %4 = vector.load %arg3[%c0_2, %c0_3] : memref<256x1024xbf16, #tpu.memory_space<vmem>>, vector<256x1024xbf16>
    %cst = arith.constant dense<0.000000e+00> : vector<16x1024xf32>
    %5 = tpu.matmul %3, %4, %cst {dimension_numbers = #tpu.dot_dimension_numbers<[1], [0], [0], [1], [0, 0, 1, 1], [], []>} : vector<16x256xbf16>, vector<256x1024xbf16>, vector<16x1024xf32> -> vector<16x1024xf32>
    %6 = vector.extract_strided_slice %5 {offsets = [0, 0], sizes = [16, 512], strides = [1, 1]} : vector<16x1024xf32> to vector<16x512xf32>
    %7 = vector.extract_strided_slice %5 {offsets = [0, 512], sizes = [16, 512], strides = [1, 1]} : vector<16x1024xf32> to vector<16x512xf32>
    %8 = arith.negf %6 : vector<16x512xf32>
    %9 = math.exp %8 : vector<16x512xf32>
    %cst_4 = arith.constant 1.000000e+00 : f32
    %10 = vector.broadcast %cst_4 : f32 to vector<16x512xf32>
    %11 = arith.addf %10, %9 : vector<16x512xf32>
    %12 = arith.divf %10, %11 : vector<16x512xf32>
    %13 = arith.mulf %6, %12 : vector<16x512xf32>
    %14 = arith.mulf %13, %7 : vector<16x512xf32>
    %c0_5 = arith.constant 0 : index
    %c0_6 = arith.constant 0 : index
    %15 = vector.load %arg6[%c0_5, %c0_6] : memref<16x256xf32, #tpu.memory_space<vmem>>, vector<16x256xf32>
    %16 = arith.truncf %14 : vector<16x512xf32> to vector<16x512xbf16>
    %c0_7 = arith.constant 0 : index
    %c0_8 = arith.constant 0 : index
    %17 = vector.load %arg4[%c0_7, %c0_8] : memref<512x256xbf16, #tpu.memory_space<vmem>>, vector<512x256xbf16>
    %cst_9 = arith.constant dense<0.000000e+00> : vector<16x256xf32>
    %18 = tpu.matmul %16, %17, %cst_9 {dimension_numbers = #tpu.dot_dimension_numbers<[1], [0], [0], [1], [0, 0, 1, 1], [], []>} : vector<16x512xbf16>, vector<512x256xbf16>, vector<16x256xf32> -> vector<16x256xf32>
    %19 = arith.addf %15, %18 : vector<16x256xf32>
    %c0_10 = arith.constant 0 : index
    %c0_11 = arith.constant 0 : index
    %20 = vector.load %arg6[%c0_10, %c0_11] : memref<16x256xf32, #tpu.memory_space<vmem>>, vector<16x256xf32>
    tpu.vector_store %arg6[%c0_10, %c0_11], %19 {strides = array<i32>} : memref<16x256xf32, #tpu.memory_space<vmem>>, vector<16x256xf32>,
    %c0_i32_12 = arith.constant 0 : i32
    %21 = arith.cmpi eq, %arg1, %c0_i32_12 : i32
    %22 = arith.extui %21 : i1 to i32
    %c0_i32_13 = arith.constant 0 : i32
    %23 = arith.cmpi ne, %22, %c0_i32_13 : i32
    scf.if %23 {
      %c0_14 = arith.constant 0 : index
      %c0_15 = arith.constant 0 : index
      %24 = vector.load %arg6[%c0_14, %c0_15] : memref<16x256xf32, #tpu.memory_space<vmem>>, vector<16x256xf32>
      %25 = arith.truncf %24 : vector<16x256xf32> to vector<16x256xbf16>
      %c0_16 = arith.constant 0 : index
      %c0_17 = arith.constant 0 : index
      %26 = vector.load %arg5[%c0_16, %c0_17] : memref<16x256xbf16, #tpu.memory_space<vmem>>, vector<16x256xbf16>
      tpu.vector_store %arg5[%c0_16, %c0_17], %25 {strides = array<i32>} : memref<16x256xbf16, #tpu.memory_space<vmem>>, vector<16x256xbf16>,
    } else {
    }
    return
  }
  func.func @transform_0(%arg0: i32, %arg1: i32) -> (i32, i32) {
    %c0_i32 = arith.constant 0 : i32
    %c0_i32_0 = arith.constant 0 : i32
    return %arg0, %c0_i32 : i32, i32
  }
  func.func @transform_1(%arg0: i32, %arg1: i32) -> (i32, i32) {
    %c0_i32 = arith.constant 0 : i32
    %c0_i32_0 = arith.constant 0 : i32
    return %c0_i32, %arg1 : i32, i32
  }
  func.func @transform_2(%arg0: i32, %arg1: i32) -> (i32, i32) {
    %c0_i32 = arith.constant 0 : i32
    %c0_i32_0 = arith.constant 0 : i32
    return %arg1, %c0_i32 : i32, i32
  }
  func.func @transform_3(%arg0: i32, %arg1: i32) -> (i32, i32) {
    %c0_i32 = arith.constant 0 : i32
    %c0_i32_0 = arith.constant 0 : i32
    return %arg0, %c0_i32 : i32, i32
  }
}

</mosaic_0001>

<bundles_post_ra>
// kernel: tpu_custom_call.1
= control target key start
LH: loop header
LB: loop body
LE: loop exit
PB: predicated region body
PF: predicated region fallthrough
CT: control target
= control target key end

     0   :  { %8 = vsyncpa [#allocation4], 0  ;;  %s3241_s0 = inlined_call_operand.hbm [shape: bf16[16,256], index: 0, kind: input, shape index: {}]   ;;  %s3242_s1 = inlined_call_operand.hbm [shape: bf16[256,1024], index: 1, kind: input, shape index: {}]   ;;  %s3243_s2 = inlined_call_operand.hbm [shape: bf16[512,256], index: 2, kind: input, shape index: {}]   ;;  %s3244_s3 = inlined_call_operand.hbm [shape: bf16[16,256], index: 3, kind: output, shape index: {}]  }
   0x1   :  { %9 = vsyncpa [#allocation7], 0  ;;  %s28_s14 = sshll.u32 %s3242_s1, 4  ;;  %s29_s14 = int_to_ptr.hbm [resolvable:$true] %s28_s14 }
   0x2   :  { %10 = vsyncpa [#allocation5], 0  ;;  %s2905_s15 = smov [#allocation6]   ;;  %s15_s19 = sshll.u32 %s3241_s0, 4  ;;  %s16_s19 = int_to_ptr.hbm [resolvable:$true] %s15_s19 }
   0x3   :  { %s30_s16 = sshll.u32 %s2905_s15, 4  ;;  %s2906_s20 = smov 512   ;;  %s31_s16 = int_to_ptr.vmem [resolvable:$true] %s30_s16 }
   0x4   :  { %s2907_s21 = smov 32   ;;  %s2908_s22 = smov [#allocation3]  }
   0x5   :  { %36 = dma.hbm_to_vmem [thread:$0]  %s29_s14, 16384, %s31_s16, [#allocation7], %s2906_s20, %s2906_s20, %s2907_s21  }
   0x6   :  { %s17_s23 = sshll.u32 %s2908_s22, 4  ;;  %s2909_s24 = smov 128   ;;  %s18_s23 = int_to_ptr.vmem [resolvable:$true] %s17_s23 }
   0x7   :  { %s2910_s25 = smov 8   ;;  %s41_s27 = sshll.u32 %s3243_s2, 4  ;;  %s42_s27 = int_to_ptr.hbm [resolvable:$true] %s41_s27 }
   0x8   :  { %23 = dma.hbm_to_vmem [thread:$0]  %s16_s19, 256, %s18_s23, [#allocation4], %s2909_s24, %s2909_s24, %s2910_s25  }
   0x9   :  { %s2911_s28 = smov [#allocation8]  }
   0xa   :  { %s43_s0 = sshll.u32 %s2911_s28, 4  ;;  %s44_s0 = int_to_ptr.vmem [resolvable:$true] %s43_s0 }
   0xb   :  { %49 = dma.hbm_to_vmem [thread:$0]  %s42_s27, 8192, %s44_s0, [#allocation7], %s2909_s24, %s2909_s24, %s2910_s25  }
   0xc   :  { %2899 = dma.done.wait [#allocation4], 256  }
   0xd   :  { %2900 = vsyncadd [#allocation4], 4294967040 }
   0xe   :  { %2901 = dma.done.wait [#allocation7], 24576  }
   0xf   :  { %2902 = vsyncadd [#allocation7], 4294942720  ;;  %v2019_v0 = vld [vmem:[#allocation6 + $0x1c0] sm:$0xf]  ;;  %v2627_v5 = vld [vmem:[#allocation6 + $0x1c4] sm:$0xf] }
  0x10   :  { %v2631_v1 = vld [vmem:[#allocation6 + $0x1dc] sm:$0xf0]  ;;  %v2021_v6 = vld [vmem:[#allocation6 + $0x1e0] sm:$0xf0]  ;;  %s2912_s2 = smov [#allocation9]   ;;  %s1771_s5 = sshll.u32 %s3244_s3, 4  ;;  %s1772_s5 = int_to_ptr.hbm [resolvable:$true] %s1771_s5 }
  0x11   :  { %v2275_v2 = vld [vmem:[#allocation6 + $0x3c0] sm:$0xf]  ;;  %v2020_v3 = vor.u32 %v2631_v1, %v2019_v0  ;;  %v2024_v8 = vor.u32 %v2627_v5, %v2021_v6  ;;  %v2691_v9 = vld [vmem:[#allocation6 + $0x3c4] sm:$0xf]  ;;  %s1769_s29 = sshll.u32 %s2912_s2, 4  ;;  %s1770_s29 = int_to_ptr.vmem [resolvable:$true] %s1769_s29 }
  0x12   :  { %v2695_v4 = vld [vmem:[#allocation6 + $0x3dc] sm:$0xf0]  ;;  %v2277_v10 = vld [vmem:[#allocation6 + $0x3e0] sm:$0xf0] }
  0x13   :  { %v2276_v7 = vor.u32 %v2695_v4, %v2275_v2  ;;  %v1987_v11 = vld [vmem:[#allocation6 + $0x180] sm:$0xf]  ;;  %850 = vmatpush.bf16.msra.mxu0 %v2020_v3  ;;  %v2280_v12 = vor.u32 %v2691_v9, %v2277_v10  ;;  %878 = vmatpush.bf16.msra.mxu2 %v2024_v8  ;;  %v2619_v18 = vld [vmem:[#allocation6 + $0x184] sm:$0xf] }
  0x14   :  { %v2623_v13 = vld [vmem:[#allocation6 + $0x19c] sm:$0xf0]  ;;  %v1989_v19 = vld [vmem:[#allocation6 + $0x1a0] sm:$0xf0] }
  0x15   :  { %v2243_v14 = vld [vmem:[#allocation6 + $0x380] sm:$0xf]  ;;  %864 = vmatpush.bf16.msra.mxu1 %v2276_v7  ;;  %v1988_v16 = vor.u32 %v2623_v13, %v1987_v11  ;;  %v2683_v20 = vld [vmem:[#allocation6 + $0x384] sm:$0xf]  ;;  %892 = vmatpush.bf16.msra.mxu3 %v2280_v12  ;;  %v1992_v21 = vor.u32 %v2619_v18, %v1989_v19 }
  0x16   :  { %v2687_v15 = vld [vmem:[#allocation6 + $0x39c] sm:$0xf0]  ;;  %v2245_v22 = vld [vmem:[#allocation6 + $0x3a0] sm:$0xf0] }
  0x17   :  { %v2244_v17 = vor.u32 %v2687_v15, %v2243_v14  ;;  %v1955_v23 = vld [vmem:[#allocation6 + $0x140] sm:$0xf]  ;;  %v2248_v25 = vor.u32 %v2683_v20, %v2245_v22  ;;  %v2611_v28 = vld [vmem:[#allocation6 + $0x144] sm:$0xf]  ;;  %851 = vmatpush.bf16.msra.mxu0 %v1988_v16  ;;  %879 = vmatpush.bf16.msra.mxu2 %v1992_v21 }
  0x18   :  { %v2615_v24 = vld [vmem:[#allocation6 + $0x15c] sm:$0xf0]  ;;  %v1957_v30 = vld [vmem:[#allocation6 + $0x160] sm:$0xf0] }
  0x19   :  { %v2211_v26 = vld [vmem:[#allocation6 + $0x340] sm:$0xf]  ;;  %v1956_v29 = vor.u32 %v2615_v24, %v1955_v23  ;;  %v2675_v31 = vld [vmem:[#allocation6 + $0x344] sm:$0xf]  ;;  %865 = vmatpush.bf16.msra.mxu1 %v2244_v17  ;;  %v1960_v34 = vor.u32 %v2611_v28, %v1957_v30  ;;  %893 = vmatpush.bf16.msra.mxu3 %v2248_v25  ;;  %v2027_v28 = vld [vmem:[#allocation6 + $0x1c8] sm:$0xf] }
  0x1a   :  { %v2679_v27 = vld [vmem:[#allocation6 + $0x35c] sm:$0xf0]  ;;  %v2213_v32 = vld [vmem:[#allocation6 + $0x360] sm:$0xf0]  ;;  %v2283_v30 = vld [vmem:[#allocation6 + $0x3c8] sm:$0xf] }
  0x1b   :  { %v2212_v33 = vor.u32 %v2679_v27, %v2211_v26  ;;  %v1923_v35 = vld [vmem:[#allocation6 + $0x100] sm:$0xf]  ;;  %v2216_v38 = vor.u32 %v2675_v31, %v2213_v32  ;;  %v2603_v40 = vld [vmem:[#allocation6 + $0x104] sm:$0xf]  ;;  %852 = vmatpush.bf16.msra.mxu0 %v1956_v29  ;;  %880 = vmatpush.bf16.msra.mxu2 %v1960_v34  ;;  %v2632_v29 = vld [vmem:[#allocation6 + $0x1e4] sm:$0xf0] }
  0x1c   :  { %v2607_v36 = vld [vmem:[#allocation6 + $0x11c] sm:$0xf0]  ;;  %v1925_v41 = vld [vmem:[#allocation6 + $0x120] sm:$0xf0]  ;;  %v2696_v31 = vld [vmem:[#allocation6 + $0x3e4] sm:$0xf0] }
  0x1d   :  { %v2179_v37 = vld [vmem:[#allocation6 + $0x300] sm:$0xf]  ;;  %v2667_v42 = vld [vmem:[#allocation6 + $0x304] sm:$0xf]  ;;  %v1924_v44 = vor.u32 %v2607_v36, %v1923_v35  ;;  %866 = vmatpush.bf16.msra.mxu1 %v2212_v33  ;;  %v1928_v46 = vor.u32 %v2603_v40, %v1925_v41  ;;  %894 = vmatpush.bf16.msra.mxu3 %v2216_v38  ;;  %v2628_v33 = vld [vmem:[#allocation6 + $0x1cc] sm:$0xf] }
  0x1e   :  { %v2671_v39 = vld [vmem:[#allocation6 + $0x31c] sm:$0xf0]  ;;  %v2181_v43 = vld [vmem:[#allocation6 + $0x320] sm:$0xf0]  ;;  %v2029_v34 = vld [vmem:[#allocation6 + $0x1e8] sm:$0xf0] }
  0x1f   :  { %v2180_v45 = vor.u32 %v2671_v39, %v2179_v37  ;;  %v1891_v47 = vld [vmem:[#allocation6 + $0xc0] sm:$0xf]  ;;  %v2184_v50 = vor.u32 %v2667_v42, %v2181_v43  ;;  %v2595_v52 = vld [vmem:[#allocation6 + $0xc4] sm:$0xf]  ;;  %853 = vmatpush.bf16.msra.mxu0 %v1924_v44  ;;  %881 = vmatpush.bf16.msra.mxu2 %v1928_v46  ;;  %v2692_v35 = vld [vmem:[#allocation6 + $0x3cc] sm:$0xf]  ;;  %v2028_v42 = vor.u32 %v2632_v29, %v2027_v28 }
  0x20   :  { %v2599_v48 = vld [vmem:[#allocation6 + $0xdc] sm:$0xf0]  ;;  %v1893_v53 = vld [vmem:[#allocation6 + $0xe0] sm:$0xf0]  ;;  %v2285_v38 = vld [vmem:[#allocation6 + $0x3e8] sm:$0xf0]  ;;  %v2032_v46 = vor.u32 %v2628_v33, %v2029_v34 }
  0x21   :  { %v2147_v49 = vld [vmem:[#allocation6 + $0x2c0] sm:$0xf]  ;;  %v2659_v54 = vld [vmem:[#allocation6 + $0x2c4] sm:$0xf]  ;;  %v1892_v56 = vor.u32 %v2599_v48, %v1891_v47  ;;  %867 = vmatpush.bf16.msra.mxu1 %v2180_v45  ;;  %v1896_v58 = vor.u32 %v2595_v52, %v1893_v53  ;;  %895 = vmatpush.bf16.msra.mxu3 %v2184_v50  ;;  %v1787_v39 = vld [vmem:[#allocation3] sm:$0xf]  ;;  %v2284_v45 = vor.u32 %v2696_v31, %v2283_v30 }
  0x22   :  { %v2663_v51 = vld [vmem:[#allocation6 + $0x2dc] sm:$0xf0]  ;;  %v2149_v55 = vld [vmem:[#allocation6 + $0x2e0] sm:$0xf0]  ;;  %v2570_v40 = vld [vmem:[#allocation3 + $0x4] sm:$0xf0]  ;;  %v2288_v50 = vor.u32 %v2692_v35, %v2285_v38 }
  0x23   :  { %v2148_v57 = vor.u32 %v2663_v51, %v2147_v49  ;;  %v1859_v59 = vld [vmem:[#allocation6 + $0x80] sm:$0xf]  ;;  %v2152_v62 = vor.u32 %v2659_v54, %v2149_v55  ;;  %v2587_v0 = vld [vmem:[#allocation6 + $0x84] sm:$0xf]  ;;  %854 = vmatpush.bf16.msra.mxu0 %v1892_v56  ;;  %882 = vmatpush.bf16.msra.mxu2 %v1896_v58  ;;  %v2569_v43 = vld [vmem:[#allocation3 + $0x4] sm:$0xf]  ;;  %v2948_v51 = vor.u32 %v2570_v40, %v1787_v39 }
  0x24   :  { %v2591_v60 = vld [vmem:[#allocation6 + $0x9c] sm:$0xf0]  ;;  %v1861_v1 = vld [vmem:[#allocation6 + $0xa0] sm:$0xf0]  ;;  %v1789_v44 = vld [vmem:[#allocation3 + $0x8] sm:$0xf0] }
  0x25   :  { %v2115_v61 = vld [vmem:[#allocation6 + $0x280] sm:$0xf]  ;;  %v2651_v2 = vld [vmem:[#allocation6 + $0x284] sm:$0xf]  ;;  %v1860_v4 = vor.u32 %v2591_v60, %v1859_v59  ;;  %868 = vmatpush.bf16.msra.mxu1 %v2148_v57  ;;  %v1864_v6 = vor.u32 %v2587_v0, %v1861_v1  ;;  %896 = vmatpush.bf16.msra.mxu3 %v2152_v62  ;;  %v1995_v47 = vld [vmem:[#allocation6 + $0x188] sm:$0xf]  ;;  %v2950_v55 = vor.u32 %v2569_v43, %v1789_v44 }
  0x26   :  { %v2655_v63 = vld [vmem:[#allocation6 + $0x29c] sm:$0xf0]  ;;  %v2117_v3 = vld [vmem:[#allocation6 + $0x2a0] sm:$0xf0]  ;;  %v2624_v48 = vld [vmem:[#allocation6 + $0x1a4] sm:$0xf0] }
  0x27   :  { %v2116_v5 = vor.u32 %v2655_v63, %v2115_v61  ;;  %v1827_v7 = vld [vmem:[#allocation6 + $0x40] sm:$0xf]  ;;  %v2120_v10 = vor.u32 %v2651_v2, %v2117_v3  ;;  %v2579_v12 = vld [vmem:[#allocation6 + $0x44] sm:$0xf]  ;;  %855 = vmatpush.bf16.msra.mxu0 %v1860_v4  ;;  %883 = vmatpush.bf16.msra.mxu2 %v1864_v6  ;;  %v2251_v49 = vld [vmem:[#allocation6 + $0x388] sm:$0xf]  ;;  %v1996_v58 = vor.u32 %v2624_v48, %v1995_v47 }
  0x28   :  { %v2583_v8 = vld [vmem:[#allocation6 + $0x5c] sm:$0xf0]  ;;  %v1829_v13 = vld [vmem:[#allocation6 + $0x60] sm:$0xf0]  ;;  %v2688_v52 = vld [vmem:[#allocation6 + $0x3a4] sm:$0xf0] }
  0x29   :  { %v2083_v9 = vld [vmem:[#allocation6 + $0x240] sm:$0xf]  ;;  %v2643_v14 = vld [vmem:[#allocation6 + $0x244] sm:$0xf]  ;;  %v1828_v16 = vor.u32 %v2583_v8, %v1827_v7  ;;  %869 = vmatpush.bf16.msra.mxu1 %v2116_v5  ;;  %v1832_v21 = vor.u32 %v2579_v12, %v1829_v13  ;;  %897 = vmatpush.bf16.msra.mxu3 %v2120_v10  ;;  %v2620_v53 = vld [vmem:[#allocation6 + $0x18c] sm:$0xf]  ;;  %v2252_v59 = vor.u32 %v2688_v52, %v2251_v49 }
  0x2a   :  { %v2647_v11 = vld [vmem:[#allocation6 + $0x25c] sm:$0xf0]  ;;  %v2085_v15 = vld [vmem:[#allocation6 + $0x260] sm:$0xf0]  ;;  %v1997_v54 = vld [vmem:[#allocation6 + $0x1a8] sm:$0xf0] }
  0x2b   :  { %v1795_v17 = vld [vmem:[#allocation6] sm:$0xf]  ;;  %v2084_v20 = vor.u32 %v2647_v11, %v2083_v9  ;;  %v2571_v23 = vld [vmem:[#allocation6 + $0x4] sm:$0xf]  ;;  %v2088_v25 = vor.u32 %v2643_v14, %v2085_v15  ;;  %856 = vmatpush.bf16.msra.mxu0 %v1828_v16  ;;  %884 = vmatpush.bf16.msra.mxu2 %v1832_v21  ;;  %v2684_v56 = vld [vmem:[#allocation6 + $0x38c] sm:$0xf]  ;;  %v2000_v60 = vor.u32 %v2620_v53, %v1997_v54 }
  0x2c   :  { %v2575_v18 = vld [vmem:[#allocation6 + $0x1c] sm:$0xf0]  ;;  %v1797_v24 = vld [vmem:[#allocation6 + $0x20] sm:$0xf0]  ;;  %v2253_v57 = vld [vmem:[#allocation6 + $0x3a8] sm:$0xf0] }
  0x2d   :  { %v2051_v19 = vld [vmem:[#allocation6 + $0x200] sm:$0xf]  ;;  %v2635_v26 = vld [vmem:[#allocation6 + $0x204] sm:$0xf]  ;;  %v1796_v32 = vor.u32 %v2575_v18, %v1795_v17  ;;  %870 = vmatpush.bf16.msra.mxu1 %v2084_v20  ;;  %v1800_v37 = vor.u32 %v2571_v23, %v1797_v24  ;;  %898 = vmatpush.bf16.msra.mxu3 %v2088_v25  ;;  %v1963_v61 = vld [vmem:[#allocation6 + $0x148] sm:$0xf]  ;;  %v2256_v0 = vor.u32 %v2684_v56, %v2253_v57 }
  0x2e   :  { %v2639_v22 = vld [vmem:[#allocation6 + $0x21c] sm:$0xf0]  ;;  %v2053_v27 = vld [vmem:[#allocation6 + $0x220] sm:$0xf0]  ;;  %v2616_v62 = vld [vmem:[#allocation6 + $0x164] sm:$0xf0] }
  0x2f   :  { %v2052_v36 = vor.u32 %v2639_v22, %v2051_v19  ;;  %v2056_v41 = vor.u32 %v2635_v26, %v2053_v27  ;;  %857 = vmatpush.bf16.msra.mxu0 %v1796_v32  ;;  %885 = vmatpush.bf16.msra.mxu2 %v1800_v37  ;;  %v2219_v63 = vld [vmem:[#allocation6 + $0x348] sm:$0xf]  ;;  %v2612_v2 = vld [vmem:[#allocation6 + $0x14c] sm:$0xf]  ;;  %v1964_v6 = vor.u32 %v2616_v62, %v1963_v61 }
  0x30   :  { %v2680_v1 = vld [vmem:[#allocation6 + $0x364] sm:$0xf0]  ;;  %v1965_v3 = vld [vmem:[#allocation6 + $0x168] sm:$0xf0] }
  0x31   :  { %871 = vmatpush.bf16.msra.mxu1 %v2052_v36  ;;  %899 = vmatpush.bf16.msra.mxu3 %v2056_v41  ;;  %v2676_v4 = vld [vmem:[#allocation6 + $0x34c] sm:$0xf]  ;;  %v2220_v7 = vor.u32 %v2680_v1, %v2219_v63  ;;  %v1968_v8 = vor.u32 %v2612_v2, %v1965_v3  ;;  %v1931_v9 = vld [vmem:[#allocation6 + $0x108] sm:$0xf] }
  0x32   :  { %858 = vmatmul.bf16.vlgmr.msra.gmra.mxu0 %v2948_v51  ;;  %886 = vmatmul.bf16.vlgmr.msra.gmra.mxu2 %v2948_v51  ;;  %v2221_v5 = vld [vmem:[#allocation6 + $0x368] sm:$0xf0]  ;;  %v2608_v10 = vld [vmem:[#allocation6 + $0x124] sm:$0xf0] }
  0x33   :  { %906 = vmatpush.bf16.msrb.mxu0 %v2028_v42  ;;  %934 = vmatpush.bf16.msrb.mxu2 %v2032_v46  ;;  %v2187_v11 = vld [vmem:[#allocation6 + $0x308] sm:$0xf]  ;;  %v2224_v12 = vor.u32 %v2676_v4, %v2221_v5  ;;  %v2604_v14 = vld [vmem:[#allocation6 + $0x10c] sm:$0xf]  ;;  %v1932_v18 = vor.u32 %v2608_v10, %v1931_v9  ;;  %v2035_v4 = vld [vmem:[#allocation6 + $0x1d0] sm:$0xf] }
  0x34   :  { %872 = vmatmul.bf16.vlgmr.msra.gmra.mxu1 %v2950_v55  ;;  %900 = vmatmul.bf16.vlgmr.msra.gmra.mxu3 %v2950_v55  ;;  %v2672_v13 = vld [vmem:[#allocation6 + $0x324] sm:$0xf0]  ;;  %v1933_v15 = vld [vmem:[#allocation6 + $0x128] sm:$0xf0]  ;;  %v2633_v5 = vld [vmem:[#allocation6 + $0x1ec] sm:$0xf0] }
  0x35   :  { %920 = vmatpush.bf16.msrb.mxu1 %v2284_v45  ;;  %948 = vmatpush.bf16.msrb.mxu3 %v2288_v50  ;;  %v2668_v16 = vld [vmem:[#allocation6 + $0x30c] sm:$0xf]  ;;  %v2188_v19 = vor.u32 %v2672_v13, %v2187_v11  ;;  %v1936_v20 = vor.u32 %v2604_v14, %v1933_v15  ;;  %v1899_v21 = vld [vmem:[#allocation6 + $0xc8] sm:$0xf]  ;;  %v2629_v9 = vld [vmem:[#allocation6 + $0x1d4] sm:$0xf] }
  0x36   :  { %v2189_v17 = vld [vmem:[#allocation6 + $0x328] sm:$0xf0]  ;;  %v2600_v22 = vld [vmem:[#allocation6 + $0xe4] sm:$0xf0]  ;;  %v2037_v10 = vld [vmem:[#allocation6 + $0x1f0] sm:$0xf0] }
  0x37   :  { %907 = vmatpush.bf16.msrb.mxu0 %v1996_v58  ;;  %935 = vmatpush.bf16.msrb.mxu2 %v2000_v60  ;;  %v2155_v23 = vld [vmem:[#allocation6 + $0x2c8] sm:$0xf]  ;;  %v2192_v24 = vor.u32 %v2668_v16, %v2189_v17  ;;  %v2596_v26 = vld [vmem:[#allocation6 + $0xcc] sm:$0xf]  ;;  %v1900_v30 = vor.u32 %v2600_v22, %v1899_v21  ;;  %v2693_v13 = vld [vmem:[#allocation6 + $0x3d4] sm:$0xf]  ;;  %v2036_v16 = vor.u32 %v2633_v5, %v2035_v4 }
  0x38   :  { %v2664_v25 = vld [vmem:[#allocation6 + $0x2e4] sm:$0xf0]  ;;  %v1901_v27 = vld [vmem:[#allocation6 + $0xe8] sm:$0xf0]  ;;  %v2293_v14 = vld [vmem:[#allocation6 + $0x3f0] sm:$0xf0] }
  0x39   :  { %921 = vmatpush.bf16.msrb.mxu1 %v2252_v59  ;;  %949 = vmatpush.bf16.msrb.mxu3 %v2256_v0  ;;  %v2660_v28 = vld [vmem:[#allocation6 + $0x2cc] sm:$0xf]  ;;  %v2156_v31 = vor.u32 %v2664_v25, %v2155_v23  ;;  %v1904_v32 = vor.u32 %v2596_v26, %v1901_v27  ;;  %v1867_v33 = vld [vmem:[#allocation6 + $0x88] sm:$0xf]  ;;  %v2259_v21 = vld [vmem:[#allocation6 + $0x390] sm:$0xf]  ;;  %v2296_v22 = vor.u32 %v2693_v13, %v2293_v14 }
  0x3a   :  { %v2157_v29 = vld [vmem:[#allocation6 + $0x2e8] sm:$0xf0]  ;;  %v2592_v34 = vld [vmem:[#allocation6 + $0xa4] sm:$0xf0]  ;;  %v2689_v23 = vld [vmem:[#allocation6 + $0x3ac] sm:$0xf0] }
  0x3b   :  { %908 = vmatpush.bf16.msrb.mxu0 %v1964_v6  ;;  %936 = vmatpush.bf16.msrb.mxu2 %v1968_v8  ;;  %v2123_v35 = vld [vmem:[#allocation6 + $0x288] sm:$0xf]  ;;  %v2160_v36 = vor.u32 %v2660_v28, %v2157_v29  ;;  %v2588_v38 = vld [vmem:[#allocation6 + $0x8c] sm:$0xf]  ;;  %v1868_v42 = vor.u32 %v2592_v34, %v1867_v33  ;;  %v2291_v6 = vld [vmem:[#allocation6 + $0x3d0] sm:$0xf]  ;;  %v2260_v29 = vor.u32 %v2689_v23, %v2259_v21 }
  0x3c   :  { %v2656_v37 = vld [vmem:[#allocation6 + $0x2a4] sm:$0xf0]  ;;  %v1869_v39 = vld [vmem:[#allocation6 + $0xa8] sm:$0xf0]  ;;  %v2697_v8 = vld [vmem:[#allocation6 + $0x3ec] sm:$0xf0] }
  0x3d   :  { %922 = vmatpush.bf16.msrb.mxu1 %v2220_v7  ;;  %950 = vmatpush.bf16.msrb.mxu3 %v2224_v12  ;;  %v2652_v40 = vld [vmem:[#allocation6 + $0x28c] sm:$0xf]  ;;  %v2124_v43 = vor.u32 %v2656_v37, %v2123_v35  ;;  %v1872_v44 = vor.u32 %v2588_v38, %v1869_v39  ;;  %v1835_v45 = vld [vmem:[#allocation6 + $0x48] sm:$0xf]  ;;  %v2292_v17 = vor.u32 %v2697_v8, %v2291_v6  ;;  %v2005_v25 = vld [vmem:[#allocation6 + $0x1b0] sm:$0xf0] }
  0x3e   :  { %v2125_v41 = vld [vmem:[#allocation6 + $0x2a8] sm:$0xf0]  ;;  %v2584_v46 = vld [vmem:[#allocation6 + $0x64] sm:$0xf0]  ;;  %v2685_v26 = vld [vmem:[#allocation6 + $0x394] sm:$0xf] }
  0x3f   :  { %909 = vmatpush.bf16.msrb.mxu0 %v1932_v18  ;;  %937 = vmatpush.bf16.msrb.mxu2 %v1936_v20  ;;  %v2091_v47 = vld [vmem:[#allocation6 + $0x248] sm:$0xf]  ;;  %v2128_v48 = vor.u32 %v2652_v40, %v2125_v41  ;;  %v2580_v50 = vld [vmem:[#allocation6 + $0x4c] sm:$0xf]  ;;  %v1836_v56 = vor.u32 %v2584_v46, %v1835_v45  ;;  %v2040_v18 = vor.u32 %v2629_v9, %v2037_v10  ;;  %v2625_v20 = vld [vmem:[#allocation6 + $0x1ac] sm:$0xf0] }
  0x40   :  { %v2648_v49 = vld [vmem:[#allocation6 + $0x264] sm:$0xf0]  ;;  %v1837_v52 = vld [vmem:[#allocation6 + $0x68] sm:$0xf0]  ;;  %v2261_v27 = vld [vmem:[#allocation6 + $0x3b0] sm:$0xf0] }
  0x41   :  { %923 = vmatpush.bf16.msrb.mxu1 %v2188_v19  ;;  %951 = vmatpush.bf16.msrb.mxu3 %v2192_v24  ;;  %v2644_v53 = vld [vmem:[#allocation6 + $0x24c] sm:$0xf]  ;;  %v1803_v57 = vld [vmem:[#allocation6 + $0x8] sm:$0xf]  ;;  %v2092_v59 = vor.u32 %v2648_v49, %v2091_v47  ;;  %v1840_v60 = vor.u32 %v2580_v50, %v1837_v52  ;;  %v2003_v19 = vld [vmem:[#allocation6 + $0x190] sm:$0xf]  ;;  %v2264_v34 = vor.u32 %v2685_v26, %v2261_v27 }
  0x42   :  { %v2093_v54 = vld [vmem:[#allocation6 + $0x268] sm:$0xf0]  ;;  %v2576_v58 = vld [vmem:[#allocation6 + $0x24] sm:$0xf0]  ;;  %v2621_v24 = vld [vmem:[#allocation6 + $0x194] sm:$0xf]  ;;  %v2004_v28 = vor.u32 %v2625_v20, %v2003_v19 }
  0x43   :  { %910 = vmatpush.bf16.msrb.mxu0 %v1900_v30  ;;  %938 = vmatpush.bf16.msrb.mxu2 %v1904_v32  ;;  %v2059_v61 = vld [vmem:[#allocation6 + $0x208] sm:$0xf]  ;;  %v2572_v63 = vld [vmem:[#allocation6 + $0xc] sm:$0xf]  ;;  %v2096_v0 = vor.u32 %v2644_v53, %v2093_v54  ;;  %v1804_v7 = vor.u32 %v2576_v58, %v1803_v57  ;;  %v2008_v30 = vor.u32 %v2621_v24, %v2005_v25  ;;  %v2617_v32 = vld [vmem:[#allocation6 + $0x16c] sm:$0xf0] }
  0x44   :  { %v2640_v62 = vld [vmem:[#allocation6 + $0x224] sm:$0xf0]  ;;  %v1805_v1 = vld [vmem:[#allocation6 + $0x28] sm:$0xf0]  ;;  %v2227_v33 = vld [vmem:[#allocation6 + $0x350] sm:$0xf] }
  0x45   :  { %924 = vmatpush.bf16.msrb.mxu1 %v2156_v31  ;;  %952 = vmatpush.bf16.msrb.mxu3 %v2160_v36  ;;  %v2636_v2 = vld [vmem:[#allocation6 + $0x20c] sm:$0xf]  ;;  %v2060_v11 = vor.u32 %v2640_v62, %v2059_v61  ;;  %v1808_v12 = vor.u32 %v2572_v63, %v1805_v1  ;;  %v1971_v31 = vld [vmem:[#allocation6 + $0x150] sm:$0xf]  ;;  %v2613_v36 = vld [vmem:[#allocation6 + $0x154] sm:$0xf] }
  0x46   :  { %v2061_v3 = vld [vmem:[#allocation6 + $0x228] sm:$0xf0]  ;;  %v2681_v35 = vld [vmem:[#allocation6 + $0x36c] sm:$0xf0]  ;;  %v1973_v37 = vld [vmem:[#allocation6 + $0x170] sm:$0xf0]  ;;  %v1972_v40 = vor.u32 %v2617_v32, %v1971_v31 }
  0x47   :  { %911 = vmatpush.bf16.msrb.mxu0 %v1868_v42  ;;  %939 = vmatpush.bf16.msrb.mxu2 %v1872_v44  ;;  %v2064_v15 = vor.u32 %v2636_v2, %v2061_v3  ;;  %v2677_v38 = vld [vmem:[#allocation6 + $0x354] sm:$0xf]  ;;  %v2228_v41 = vor.u32 %v2681_v35, %v2227_v33  ;;  %v1976_v42 = vor.u32 %v2613_v36, %v1973_v37  ;;  %v2609_v44 = vld [vmem:[#allocation6 + $0x12c] sm:$0xf0] }
  0x48   :  { %v2229_v39 = vld [vmem:[#allocation6 + $0x370] sm:$0xf0]  ;;  %v2195_v45 = vld [vmem:[#allocation6 + $0x310] sm:$0xf] }
  0x49   :  { %925 = vmatpush.bf16.msrb.mxu1 %v2124_v43  ;;  %953 = vmatpush.bf16.msrb.mxu3 %v2128_v48  ;;  %v1939_v43 = vld [vmem:[#allocation6 + $0x110] sm:$0xf]  ;;  %v2232_v46 = vor.u32 %v2677_v38, %v2229_v39  ;;  %v2605_v48 = vld [vmem:[#allocation6 + $0x114] sm:$0xf]  ;;  %v2043_v38 = vld [vmem:[#allocation6 + $0x1d8] sm:$0xf] }
  0x4a   :  { %v2673_v47 = vld [vmem:[#allocation6 + $0x32c] sm:$0xf0]  ;;  %v1941_v49 = vld [vmem:[#allocation6 + $0x130] sm:$0xf0]  ;;  %v1940_v53 = vor.u32 %v2609_v44, %v1939_v43  ;;  %v2634_v39 = vld [vmem:[#allocation6 + $0x1f4] sm:$0xf0] }
  0x4b   :  { %912 = vmatpush.bf16.msrb.mxu0 %v1836_v56  ;;  %940 = vmatpush.bf16.msrb.mxu2 %v1840_v60  ;;  %v2669_v50 = vld [vmem:[#allocation6 + $0x314] sm:$0xf]  ;;  %v2196_v54 = vor.u32 %v2673_v47, %v2195_v45  ;;  %v1944_v56 = vor.u32 %v2605_v48, %v1941_v49  ;;  %v1907_v57 = vld [vmem:[#allocation6 + $0xd0] sm:$0xf]  ;;  %v2630_v43 = vld [vmem:[#allocation6 + $0x1dc] sm:$0xf] }
  0x4c   :  { %v2197_v52 = vld [vmem:[#allocation6 + $0x330] sm:$0xf0]  ;;  %v2601_v58 = vld [vmem:[#allocation6 + $0xec] sm:$0xf0]  ;;  %v2045_v44 = vld [vmem:[#allocation6 + $0x1f8] sm:$0xf0] }
  0x4d   :  { %926 = vmatpush.bf16.msrb.mxu1 %v2092_v59  ;;  %954 = vmatpush.bf16.msrb.mxu3 %v2096_v0  ;;  %v2163_v59 = vld [vmem:[#allocation6 + $0x2d0] sm:$0xf]  ;;  %v2200_v60 = vor.u32 %v2669_v50, %v2197_v52  ;;  %v2597_v62 = vld [vmem:[#allocation6 + $0xd4] sm:$0xf]  ;;  %v1908_v2 = vor.u32 %v2601_v58, %v1907_v57  ;;  %v2694_v47 = vld [vmem:[#allocation6 + $0x3dc] sm:$0xf]  ;;  %v2044_v50 = vor.u32 %v2634_v39, %v2043_v38 }
  0x4e   :  { %v2665_v61 = vld [vmem:[#allocation6 + $0x2ec] sm:$0xf0]  ;;  %v1909_v63 = vld [vmem:[#allocation6 + $0xf0] sm:$0xf0]  ;;  %v2301_v48 = vld [vmem:[#allocation6 + $0x3f8] sm:$0xf0] }
  0x4f   :  { %913 = vmatpush.bf16.msrb.mxu0 %v1804_v7  ;;  %941 = vmatpush.bf16.msrb.mxu2 %v1808_v12  ;;  %v2661_v0 = vld [vmem:[#allocation6 + $0x2d4] sm:$0xf]  ;;  %v2164_v3 = vor.u32 %v2665_v61, %v2163_v59  ;;  %v1912_v4 = vor.u32 %v2597_v62, %v1909_v63  ;;  %v1875_v5 = vld [vmem:[#allocation6 + $0x90] sm:$0xf]  ;;  %v2267_v57 = vld [vmem:[#allocation6 + $0x398] sm:$0xf]  ;;  %v2304_v58 = vor.u32 %v2694_v47, %v2301_v48 }
  0x50   :  { %v2165_v1 = vld [vmem:[#allocation6 + $0x2f0] sm:$0xf0]  ;;  %v2593_v6 = vld [vmem:[#allocation6 + $0xac] sm:$0xf0]  ;;  %v2690_v59 = vld [vmem:[#allocation6 + $0x3b4] sm:$0xf0] }
  0x51   :  { %927 = vmatpush.bf16.msrb.mxu1 %v2060_v11  ;;  %955 = vmatpush.bf16.msrb.mxu3 %v2064_v15  ;;  %v2131_v7 = vld [vmem:[#allocation6 + $0x290] sm:$0xf]  ;;  %v2168_v8 = vor.u32 %v2661_v0, %v2165_v1  ;;  %v2589_v10 = vld [vmem:[#allocation6 + $0x94] sm:$0xf]  ;;  %v1876_v14 = vor.u32 %v2593_v6, %v1875_v5  ;;  %v2013_v61 = vld [vmem:[#allocation6 + $0x1b8] sm:$0xf0]  ;;  %v2268_v1 = vor.u32 %v2690_v59, %v2267_v57 }
  0x52   :  { %914 = vmatmul.bf16.vlgmr.msrb.gmra.mxu0 %v2948_v51  ;;  %942 = vmatmul.bf16.vlgmr.msrb.gmra.mxu2 %v2948_v51  ;;  %v2657_v9 = vld [vmem:[#allocation6 + $0x2ac] sm:$0xf0]  ;;  %v1877_v11 = vld [vmem:[#allocation6 + $0xb0] sm:$0xf0]  ;;  %v2686_v62 = vld [vmem:[#allocation6 + $0x39c] sm:$0xf] }
  0x53   :  { %962 = vmatpush.bf16.msra.mxu0 %v2036_v16  ;;  %990 = vmatpush.bf16.msra.mxu2 %v2040_v18  ;;  %v2653_v12 = vld [vmem:[#allocation6 + $0x294] sm:$0xf]  ;;  %v2132_v15 = vor.u32 %v2657_v9, %v2131_v7  ;;  %v1880_v16 = vor.u32 %v2589_v10, %v1877_v11  ;;  %v2585_v18 = vld [vmem:[#allocation6 + $0x6c] sm:$0xf0]  ;;  %v2269_v63 = vld [vmem:[#allocation6 + $0x3b8] sm:$0xf0] }
  0x54   :  { %928 = vmatmul.bf16.vlgmr.msrb.gmra.mxu1 %v2950_v55  ;;  %956 = vmatmul.bf16.vlgmr.msrb.gmra.mxu3 %v2950_v55  ;;  %v2133_v13 = vld [vmem:[#allocation6 + $0x2b0] sm:$0xf0]  ;;  %v2099_v19 = vld [vmem:[#allocation6 + $0x250] sm:$0xf]  ;;  %v2235_v5 = vld [vmem:[#allocation6 + $0x358] sm:$0xf]  ;;  %v2272_v6 = vor.u32 %v2686_v62, %v2269_v63 }
  0x55   :  { %976 = vmatpush.bf16.msra.mxu1 %v2292_v17  ;;  %1004 = vmatpush.bf16.msra.mxu3 %v2296_v22  ;;  %v1843_v17 = vld [vmem:[#allocation6 + $0x50] sm:$0xf]  ;;  %v2136_v20 = vor.u32 %v2653_v12, %v2133_v13  ;;  %v2581_v22 = vld [vmem:[#allocation6 + $0x54] sm:$0xf]  ;;  %v2682_v7 = vld [vmem:[#allocation6 + $0x374] sm:$0xf0] }
  0x56   :  { %v2649_v21 = vld [vmem:[#allocation6 + $0x26c] sm:$0xf0]  ;;  %v1845_v23 = vld [vmem:[#allocation6 + $0x70] sm:$0xf0]  ;;  %v1844_v26 = vor.u32 %v2585_v18, %v1843_v17  ;;  %v1981_v9 = vld [vmem:[#allocation6 + $0x178] sm:$0xf0]  ;;  %v2236_v13 = vor.u32 %v2682_v7, %v2235_v5 }
  0x57   :  { %963 = vmatpush.bf16.msra.mxu0 %v2004_v28  ;;  %991 = vmatpush.bf16.msra.mxu2 %v2008_v30  ;;  %v2645_v24 = vld [vmem:[#allocation6 + $0x254] sm:$0xf]  ;;  %v1811_v27 = vld [vmem:[#allocation6 + $0x10] sm:$0xf]  ;;  %v1848_v30 = vor.u32 %v2581_v22, %v1845_v23  ;;  %v2678_v10 = vld [vmem:[#allocation6 + $0x35c] sm:$0xf] }
  0x58   :  { %v2101_v25 = vld [vmem:[#allocation6 + $0x270] sm:$0xf0]  ;;  %v2577_v28 = vld [vmem:[#allocation6 + $0x2c] sm:$0xf0]  ;;  %v2237_v11 = vld [vmem:[#allocation6 + $0x378] sm:$0xf0] }
  0x59   :  { %977 = vmatpush.bf16.msra.mxu1 %v2260_v29  ;;  %1005 = vmatpush.bf16.msra.mxu3 %v2264_v34  ;;  %v2100_v29 = vor.u32 %v2649_v21, %v2099_v19  ;;  %v2067_v31 = vld [vmem:[#allocation6 + $0x210] sm:$0xf]  ;;  %v2573_v33 = vld [vmem:[#allocation6 + $0x14] sm:$0xf]  ;;  %v2104_v34 = vor.u32 %v2645_v24, %v2101_v25  ;;  %v2203_v17 = vld [vmem:[#allocation6 + $0x318] sm:$0xf]  ;;  %v2240_v18 = vor.u32 %v2678_v10, %v2237_v11 }
  0x5a   :  { %v2641_v32 = vld [vmem:[#allocation6 + $0x22c] sm:$0xf0]  ;;  %v1813_v35 = vld [vmem:[#allocation6 + $0x30] sm:$0xf0]  ;;  %v2674_v19 = vld [vmem:[#allocation6 + $0x334] sm:$0xf0] }
  0x5b   :  { %964 = vmatpush.bf16.msra.mxu0 %v1972_v40  ;;  %992 = vmatpush.bf16.msra.mxu2 %v1976_v42  ;;  %v2637_v36 = vld [vmem:[#allocation6 + $0x214] sm:$0xf]  ;;  %v2299_v40 = vld [vmem:[#allocation6 + $0x3d8] sm:$0xf]  ;;  %v2068_v45 = vor.u32 %v2641_v32, %v2067_v31  ;;  %v1949_v21 = vld [vmem:[#allocation6 + $0x138] sm:$0xf0]  ;;  %v2204_v25 = vor.u32 %v2674_v19, %v2203_v17 }
  0x5c   :  { %v2069_v37 = vld [vmem:[#allocation6 + $0x230] sm:$0xf0]  ;;  %v2698_v42 = vld [vmem:[#allocation6 + $0x3f4] sm:$0xf0]  ;;  %v2670_v22 = vld [vmem:[#allocation6 + $0x31c] sm:$0xf] }
  0x5d   :  { %978 = vmatpush.bf16.msra.mxu1 %v2228_v41  ;;  %1006 = vmatpush.bf16.msra.mxu3 %v2232_v46  ;;  %v1812_v41 = vor.u32 %v2577_v28, %v1811_v27  ;;  %v1816_v46 = vor.u32 %v2573_v33, %v1813_v35  ;;  %v2072_v49 = vor.u32 %v2637_v36, %v2069_v37  ;;  %v2205_v23 = vld [vmem:[#allocation6 + $0x338] sm:$0xf0]  ;;  %v1915_v27 = vld [vmem:[#allocation6 + $0xd8] sm:$0xf]  ;;  %v2363_v17 = vld [vmem:[#allocation8 + $0x60] sm:$0xf] }
  0x5e   :  { %v2300_v52 = vor.u32 %v2698_v42, %v2299_v40  ;;  %v2602_v28 = vld [vmem:[#allocation6 + $0xf4] sm:$0xf0]  ;;  %v2598_v32 = vld [vmem:[#allocation6 + $0xdc] sm:$0xf] }
  0x5f   :  { %965 = vmatpush.bf16.msra.mxu0 %v1940_v53  ;;  %993 = vmatpush.bf16.msra.mxu2 %v1944_v56  ;;  %v2048_v53 = vor.u32 %v2630_v43, %v2045_v44  ;;  %v2626_v56 = vld [vmem:[#allocation6 + $0x1b4] sm:$0xf0]  ;;  %v1917_v33 = vld [vmem:[#allocation6 + $0xf8] sm:$0xf0]  ;;  %v1916_v36 = vor.u32 %v2602_v28, %v1915_v27  ;;  %v2728_v28 = vld [vmem:[#allocation8 + $0xe4] sm:$0xf0] }
  0x60   :  { %v2666_v31 = vld [vmem:[#allocation6 + $0x2f4] sm:$0xf0]  ;;  %v2173_v35 = vld [vmem:[#allocation6 + $0x2f8] sm:$0xf0]  ;;  %v1920_v38 = vor.u32 %v2598_v32, %v1917_v33 }
  0x61   :  { %979 = vmatpush.bf16.msra.mxu1 %v2196_v54  ;;  %1007 = vmatpush.bf16.msra.mxu3 %v2200_v60  ;;  %v2011_v54 = vld [vmem:[#allocation6 + $0x198] sm:$0xf]  ;;  %v2622_v60 = vld [vmem:[#allocation6 + $0x19c] sm:$0xf] }
  0x62   :  { %v2012_v0 = vor.u32 %v2626_v56, %v2011_v54  ;;  %v1883_v39 = vld [vmem:[#allocation6 + $0x98] sm:$0xf]  ;;  %v2590_v44 = vld [vmem:[#allocation6 + $0x9c] sm:$0xf] }
  0x63   :  { %966 = vmatpush.bf16.msra.mxu0 %v1908_v2  ;;  %994 = vmatpush.bf16.msra.mxu2 %v1912_v4  ;;  %v2016_v2 = vor.u32 %v2622_v60, %v2013_v61  ;;  %v2618_v4 = vld [vmem:[#allocation6 + $0x174] sm:$0xf0]  ;;  %v2141_v47 = vld [vmem:[#allocation6 + $0x2b8] sm:$0xf0] }
  0x64   :  { %v2594_v40 = vld [vmem:[#allocation6 + $0xb4] sm:$0xf0]  ;;  %v1853_v59 = vld [vmem:[#allocation6 + $0x78] sm:$0xf0] }
  0x65   :  { %980 = vmatpush.bf16.msra.mxu1 %v2164_v3  ;;  %1008 = vmatpush.bf16.msra.mxu3 %v2168_v8  ;;  %v1979_v3 = vld [vmem:[#allocation6 + $0x158] sm:$0xf]  ;;  %v2614_v8 = vld [vmem:[#allocation6 + $0x15c] sm:$0xf]  ;;  %v1884_v48 = vor.u32 %v2594_v40, %v1883_v39  ;;  %v2339_v40 = vld [vmem:[#allocation8 + $0x30] sm:$0xf] }
  0x66   :  { %v1980_v12 = vor.u32 %v2618_v4, %v1979_v3  ;;  %v2658_v43 = vld [vmem:[#allocation6 + $0x2b4] sm:$0xf0]  ;;  %v2646_v60 = vld [vmem:[#allocation6 + $0x25c] sm:$0xf] }
  0x67   :  { %967 = vmatpush.bf16.msra.mxu0 %v1876_v14  ;;  %995 = vmatpush.bf16.msra.mxu2 %v1880_v16  ;;  %v1984_v14 = vor.u32 %v2614_v8, %v1981_v9  ;;  %v2610_v16 = vld [vmem:[#allocation6 + $0x134] sm:$0xf0]  ;;  %v2109_v61 = vld [vmem:[#allocation6 + $0x278] sm:$0xf0] }
  0x68   :  { %v2107_v54 = vld [vmem:[#allocation6 + $0x258] sm:$0xf]  ;;  %v2112_v4 = vor.u32 %v2646_v60, %v2109_v61  ;;  %v1821_v7 = vld [vmem:[#allocation6 + $0x38] sm:$0xf0]  ;;  %v2323_v61 = vld [vmem:[#allocation8 + $0x10] sm:$0xf] }
  0x69   :  { %981 = vmatpush.bf16.msra.mxu1 %v2132_v15  ;;  %1009 = vmatpush.bf16.msra.mxu3 %v2136_v20  ;;  %v1947_v15 = vld [vmem:[#allocation6 + $0x118] sm:$0xf]  ;;  %v2606_v20 = vld [vmem:[#allocation6 + $0x11c] sm:$0xf] }
  0x6a   :  { %v1948_v24 = vor.u32 %v2610_v16, %v1947_v15  ;;  %v2650_v57 = vld [vmem:[#allocation6 + $0x274] sm:$0xf0]  ;;  %v2638_v8 = vld [vmem:[#allocation6 + $0x21c] sm:$0xf] }
  0x6b   :  { %968 = vmatpush.bf16.msra.mxu0 %v1844_v26  ;;  %996 = vmatpush.bf16.msra.mxu2 %v1848_v30  ;;  %v1952_v26 = vor.u32 %v2606_v20, %v1949_v21  ;;  %v2208_v30 = vor.u32 %v2670_v22, %v2205_v23  ;;  %v2108_v63 = vor.u32 %v2650_v57, %v2107_v54  ;;  %v2075_v3 = vld [vmem:[#allocation6 + $0x218] sm:$0xf]  ;;  %v2077_v9 = vld [vmem:[#allocation6 + $0x238] sm:$0xf0]  ;;  %v2435_v22 = vld [vmem:[#allocation8 + $0xf0] sm:$0xf] }
  0x6c   :  { %v2642_v5 = vld [vmem:[#allocation6 + $0x234] sm:$0xf0]  ;;  %v2403_v54 = vld [vmem:[#allocation8 + $0xb0] sm:$0xf] }
  0x6d   :  { %982 = vmatpush.bf16.msra.mxu1 %v2100_v29  ;;  %1010 = vmatpush.bf16.msra.mxu3 %v2104_v34  ;;  %v2171_v29 = vld [vmem:[#allocation6 + $0x2d8] sm:$0xf]  ;;  %v2662_v34 = vld [vmem:[#allocation6 + $0x2dc] sm:$0xf]  ;;  %v2076_v11 = vor.u32 %v2642_v5, %v2075_v3  ;;  %v2700_v5 = vld [vmem:[#allocation8 + $0x4] sm:$0xf0] }
  0x6e   :  { %v2172_v37 = vor.u32 %v2666_v31, %v2171_v29  ;;  %v2176_v42 = vor.u32 %v2662_v34, %v2173_v35  ;;  %v2714_v15 = vld [vmem:[#allocation8 + $0x74] sm:$0xf0]  ;;  %v2347_v29 = vld [vmem:[#allocation8 + $0x40] sm:$0xf]  ;;  %v2419_v34 = vld [vmem:[#allocation8 + $0xd0] sm:$0xf] }
  0x6f   :  { %969 = vmatpush.bf16.msra.mxu0 %v1812_v41  ;;  %997 = vmatpush.bf16.msra.mxu2 %v1816_v46  ;;  %v2139_v41 = vld [vmem:[#allocation6 + $0x298] sm:$0xf]  ;;  %v2654_v46 = vld [vmem:[#allocation6 + $0x29c] sm:$0xf] }
  0x70   :  { %v2144_v56 = vor.u32 %v2654_v46, %v2141_v47  ;;  %v2730_v23 = vld [vmem:[#allocation8 + $0xf4] sm:$0xf0] }
  0x71   :  { %983 = vmatpush.bf16.msra.mxu1 %v2068_v45  ;;  %1011 = vmatpush.bf16.msra.mxu3 %v2072_v49  ;;  %v1885_v45 = vld [vmem:[#allocation6 + $0xb8] sm:$0xf0]  ;;  %v2140_v49 = vor.u32 %v2658_v43, %v2139_v41  ;;  %v2726_v35 = vld [vmem:[#allocation8 + $0xd4] sm:$0xf0] }
  0x72   :  { %970 = vmatmul.bf16.vlgmr.msra.gmra.mxu0 %v2948_v51  ;;  %998 = vmatmul.bf16.vlgmr.msra.gmra.mxu2 %v2948_v51  ;;  %v2706_v41 = vld [vmem:[#allocation8 + $0x34] sm:$0xf0] }
  0x73   :  { %1018 = vmatpush.bf16.msrb.mxu0 %v2044_v50  ;;  %1046 = vmatpush.bf16.msrb.mxu2 %v2048_v53  ;;  %v1888_v50 = vor.u32 %v2590_v44, %v1885_v45  ;;  %v2586_v53 = vld [vmem:[#allocation6 + $0x74] sm:$0xf0]  ;;  %v2340_v43 = vor.u32 %v2706_v41, %v2339_v40  ;;  %v2411_v44 = vld [vmem:[#allocation8 + $0xc0] sm:$0xf]  ;;  %v2724_v45 = vld [vmem:[#allocation8 + $0xc4] sm:$0xf0] }
  0x74   :  { %984 = vmatmul.bf16.vlgmr.msra.gmra.mxu1 %v2950_v55  ;;  %1012 = vmatmul.bf16.vlgmr.msra.gmra.mxu3 %v2950_v55  ;;  %v2412_v47 = vor.u32 %v2724_v45, %v2411_v44  ;;  %v2709_v41 = vld [vmem:[#allocation8 + $0x54] sm:$0xf]  ;;  %v2555_v44 = vld [vmem:[#allocation8 + $0x1e0] sm:$0xf] }
  0x75   :  { %1032 = vmatpush.bf16.msrb.mxu1 %v2300_v52  ;;  %1060 = vmatpush.bf16.msrb.mxu3 %v2304_v58  ;;  %v1851_v52 = vld [vmem:[#allocation6 + $0x58] sm:$0xf]  ;;  %v2582_v58 = vld [vmem:[#allocation6 + $0x5c] sm:$0xf] }
  0x76   :  { %v1852_v62 = vor.u32 %v2586_v53, %v1851_v52 }
  0x77   :  { %1019 = vmatpush.bf16.msrb.mxu0 %v2012_v0  ;;  %1047 = vmatpush.bf16.msrb.mxu2 %v2016_v2  ;;  %v1856_v0 = vor.u32 %v2582_v58, %v1853_v59  ;;  %v2578_v2 = vld [vmem:[#allocation6 + $0x34] sm:$0xf0] }
  0x79   :  { %1033 = vmatpush.bf16.msrb.mxu1 %v2268_v1  ;;  %1061 = vmatpush.bf16.msrb.mxu3 %v2272_v6  ;;  %v1819_v1 = vld [vmem:[#allocation6 + $0x18] sm:$0xf]  ;;  %v2574_v6 = vld [vmem:[#allocation6 + $0x1c] sm:$0xf] }
  0x7a   :  { %v1820_v10 = vor.u32 %v2578_v2, %v1819_v1  ;;  %v2720_v2 = vld [vmem:[#allocation8 + $0xa4] sm:$0xf0] }
  0x7b   :  { %1020 = vmatpush.bf16.msrb.mxu0 %v1980_v12  ;;  %1048 = vmatpush.bf16.msrb.mxu2 %v1984_v14  ;;  %v1824_v12 = vor.u32 %v2574_v6, %v1821_v7  ;;  %v2371_v14 = vld [vmem:[#allocation8 + $0x70] sm:$0xf] }
  0x7c   :  { %v2372_v16 = vor.u32 %v2714_v15, %v2371_v14  ;;  %v2499_v7 = vld [vmem:[#allocation8 + $0x170] sm:$0xf] }
  0x7d   :  { %1034 = vmatpush.bf16.msrb.mxu1 %v2236_v13  ;;  %1062 = vmatpush.bf16.msrb.mxu3 %v2240_v18  ;;  %v2080_v13 = vor.u32 %v2638_v8, %v2077_v9  ;;  %v2712_v18 = vld [vmem:[#allocation8 + $0x64] sm:$0xf0]  ;;  %v2746_v8 = vld [vmem:[#allocation8 + $0x174] sm:$0xf0]  ;;  %v2713_v9 = vld [vmem:[#allocation8 + $0x74] sm:$0xf] }
  0x7e   :  { %v2364_v21 = vor.u32 %v2712_v18, %v2363_v17  ;;  %v2718_v17 = vld [vmem:[#allocation8 + $0x94] sm:$0xf0] }
  0x7f   :  { %1021 = vmatpush.bf16.msrb.mxu0 %v1948_v24  ;;  %1049 = vmatpush.bf16.msrb.mxu2 %v1952_v26  ;;  %v2436_v24 = vor.u32 %v2730_v23, %v2435_v22  ;;  %v2710_v26 = vld [vmem:[#allocation8 + $0x54] sm:$0xf0]  ;;  %v2711_v22 = vld [vmem:[#allocation8 + $0x64] sm:$0xf] }
  0x81   :  { %1035 = vmatpush.bf16.msrb.mxu1 %v2204_v25  ;;  %1063 = vmatpush.bf16.msrb.mxu3 %v2208_v30  ;;  %v2355_v25 = vld [vmem:[#allocation8 + $0x50] sm:$0xf]  ;;  %v2708_v30 = vld [vmem:[#allocation8 + $0x44] sm:$0xf0] }
  0x82   :  { %v2356_v27 = vor.u32 %v2710_v26, %v2355_v25  ;;  %v2348_v31 = vor.u32 %v2708_v30, %v2347_v29  ;;  %v2365_v26 = vld [vmem:[#allocation8 + $0x68] sm:$0xf0]  ;;  %v2716_v30 = vld [vmem:[#allocation8 + $0x84] sm:$0xf0] }
  0x83   :  { %1022 = vmatpush.bf16.msrb.mxu0 %v1916_v36  ;;  %1050 = vmatpush.bf16.msrb.mxu2 %v1920_v38  ;;  %v2420_v38 = vor.u32 %v2726_v35, %v2419_v34  ;;  %v2368_v29 = vor.u32 %v2711_v22, %v2365_v26  ;;  %v2729_v34 = vld [vmem:[#allocation8 + $0xf4] sm:$0xf]  ;;  %v2723_v26 = vld [vmem:[#allocation8 + $0xc4] sm:$0xf] }
  0x85   :  { %1036 = vmatpush.bf16.msrb.mxu1 %v2172_v37  ;;  %1064 = vmatpush.bf16.msrb.mxu3 %v2176_v42 }
  0x87   :  { %1023 = vmatpush.bf16.msrb.mxu0 %v1884_v48  ;;  %1051 = vmatpush.bf16.msrb.mxu2 %v1888_v50  ;;  %v2704_v50 = vld [vmem:[#allocation8 + $0x24] sm:$0xf0] }
  0x89   :  { %1037 = vmatpush.bf16.msrb.mxu1 %v2140_v49  ;;  %1065 = vmatpush.bf16.msrb.mxu3 %v2144_v56  ;;  %v2331_v49 = vld [vmem:[#allocation8 + $0x20] sm:$0xf]  ;;  %v2722_v56 = vld [vmem:[#allocation8 + $0xb4] sm:$0xf0] }
  0x8a   :  { %v2332_v52 = vor.u32 %v2704_v50, %v2331_v49  ;;  %v2404_v58 = vor.u32 %v2722_v56, %v2403_v54  ;;  %v2727_v49 = vld [vmem:[#allocation8 + $0xe4] sm:$0xf]  ;;  %v2740_v56 = vld [vmem:[#allocation8 + $0x144] sm:$0xf0] }
  0x8b   :  { %1024 = vmatpush.bf16.msrb.mxu0 %v1852_v62  ;;  %1052 = vmatpush.bf16.msrb.mxu2 %v1856_v0  ;;  %v2702_v62 = vld [vmem:[#allocation8 + $0x14] sm:$0xf0]  ;;  %v2395_v0 = vld [vmem:[#allocation8 + $0xa0] sm:$0xf] }
  0x8c   :  { %v2396_v3 = vor.u32 %v2720_v2, %v2395_v0  ;;  %v2547_v0 = vld [vmem:[#allocation8 + $0x1d0] sm:$0xf]  ;;  %v2758_v2 = vld [vmem:[#allocation8 + $0x1d4] sm:$0xf0] }
  0x8d   :  { %1038 = vmatpush.bf16.msrb.mxu1 %v2108_v63  ;;  %1066 = vmatpush.bf16.msrb.mxu3 %v2112_v4  ;;  %v2324_v63 = vor.u32 %v2702_v62, %v2323_v61  ;;  %v2315_v4 = vld [vmem:[#allocation8] sm:$0xf] }
  0x8e   :  { %v2316_v6 = vor.u32 %v2700_v5, %v2315_v4  ;;  %v2548_v5 = vor.u32 %v2758_v2, %v2547_v0  ;;  %v2325_v0 = vld [vmem:[#allocation8 + $0x18] sm:$0xf0]  ;;  %v2523_v2 = vld [vmem:[#allocation8 + $0x1a0] sm:$0xf] }
  0x8f   :  { %1025 = vmatpush.bf16.msrb.mxu0 %v1820_v10  ;;  %1053 = vmatpush.bf16.msrb.mxu2 %v1824_v12  ;;  %v2373_v12 = vld [vmem:[#allocation8 + $0x78] sm:$0xf0] }
  0x90   :  { %v2376_v14 = vor.u32 %v2713_v9, %v2373_v12  ;;  %v2467_v9 = vld [vmem:[#allocation8 + $0x130] sm:$0xf] }
  0x91   :  { %1039 = vmatpush.bf16.msrb.mxu1 %v2076_v11  ;;  %1067 = vmatpush.bf16.msrb.mxu3 %v2080_v13  ;;  %v2500_v11 = vor.u32 %v2746_v8, %v2499_v7  ;;  %v2421_v7 = vld [vmem:[#allocation8 + $0xd8] sm:$0xf0] }
  0x92   :  { %1026 = vmatmul.bf16.vlgmr.msrb.gmra.mxu0 %v2948_v51  ;;  %1054 = vmatmul.bf16.vlgmr.msrb.gmra.mxu2 %v2948_v51  ;;  %v2427_v51 = vld [vmem:[#allocation8 + $0xe0] sm:$0xf] }
  0x93   :  { %1634 = vmatpush.bf16.msra.mxu0 %v2372_v16  ;;  %1662 = vmatpush.bf16.msra.mxu2 %v2500_v11  ;;  %v2387_v16 = vld [vmem:[#allocation8 + $0x90] sm:$0xf] }
  0x94   :  { %1040 = vmatmul.bf16.vlgmr.msrb.gmra.mxu1 %v2950_v55  ;;  %1068 = vmatmul.bf16.vlgmr.msrb.gmra.mxu3 %v2950_v55  ;;  %v2428_v55 = vor.u32 %v2728_v28, %v2427_v51 }
  0x95   :  { %1648 = vmatpush.bf16.msra.mxu1 %v2436_v24  ;;  %v2388_v24 = vor.u32 %v2718_v17, %v2387_v16  ;;  %v2705_v16 = vld [vmem:[#allocation8 + $0x34] sm:$0xf]  ;;  %v2341_v17 = vld [vmem:[#allocation8 + $0x38] sm:$0xf0] }
  0x97   :  { %1635 = vmatpush.bf16.msra.mxu0 %v2364_v21  ;;  %v2744_v21 = vld [vmem:[#allocation8 + $0x164] sm:$0xf0] }
  0x99   :  { %1649 = vmatpush.bf16.msra.mxu1 %v2428_v55 }
  0x9b   :  { %1636 = vmatpush.bf16.msra.mxu0 %v2356_v27  ;;  %v2379_v27 = vld [vmem:[#allocation8 + $0x80] sm:$0xf] }
  0x9d   :  { %1650 = vmatpush.bf16.msra.mxu1 %v2420_v38  ;;  %v2742_v38 = vld [vmem:[#allocation8 + $0x154] sm:$0xf0] }
  0x9f   :  { %1637 = vmatpush.bf16.msra.mxu0 %v2348_v31  ;;  %v2380_v31 = vor.u32 %v2716_v30, %v2379_v27  ;;  %v2413_v27 = vld [vmem:[#allocation8 + $0xc8] sm:$0xf0] }
  0xa1   :  { %1651 = vmatpush.bf16.msra.mxu1 %v2412_v47 }
  0xa3   :  { %1638 = vmatpush.bf16.msra.mxu0 %v2340_v43  ;;  %v2357_v43 = vld [vmem:[#allocation8 + $0x58] sm:$0xf0] }
  0xa4   :  { %v2360_v47 = vor.u32 %v2709_v41, %v2357_v43  ;;  %v2531_v41 = vld [vmem:[#allocation8 + $0x1b0] sm:$0xf]  ;;  %v2754_v43 = vld [vmem:[#allocation8 + $0x1b4] sm:$0xf0] }
  0xa5   :  { %1652 = vmatpush.bf16.msra.mxu1 %v2404_v58  ;;  %v2349_v58 = vld [vmem:[#allocation8 + $0x48] sm:$0xf0] }
  0xa7   :  { %1639 = vmatpush.bf16.msra.mxu0 %v2332_v52  ;;  %v2429_v52 = vld [vmem:[#allocation8 + $0xe8] sm:$0xf0] }
  0xa8   :  { %v2432_v62 = vor.u32 %v2727_v49, %v2429_v52  ;;  %v2405_v49 = vld [vmem:[#allocation8 + $0xb8] sm:$0xf0] }
  0xa9   :  { %1653 = vmatpush.bf16.msra.mxu1 %v2396_v3 }
  0xab   :  { %1640 = vmatpush.bf16.msra.mxu0 %v2324_v63 }
  0xad   :  { %1654 = vmatpush.bf16.msra.mxu1 %v2388_v24  ;;  %v2344_v24 = vor.u32 %v2705_v16, %v2341_v17  ;;  %v2397_v16 = vld [vmem:[#allocation8 + $0xa8] sm:$0xf0]  ;;  %v2443_v17 = vld [vmem:[#allocation8 + $0x100] sm:$0xf] }
  0xaf   :  { %v859_v19 = vpop.f32.mrf.mxu0  ;;  %1641 = vmatpush.bf16.msra.mxu0 %v2316_v6  ;;  %v2725_v6 = vld [vmem:[#allocation8 + $0xd4] sm:$0xf] }
  0xb1   :  { %v873_v20 = vpop.f32.mrf.mxu1  ;;  %1655 = vmatpush.bf16.msra.mxu1 %v2380_v31  ;;  %v2736_v31 = vld [vmem:[#allocation8 + $0x124] sm:$0xf0] }
  0xb2   :  { %v2968_v39 = vadd.f32 %v873_v20, %v859_v19  ;;  %v2491_v20 = vld [vmem:[#allocation8 + $0x160] sm:$0xf] }
  0xb3   :  { %1690 = vmatpush.bf16.msrb.mxu0 %v2376_v14  ;;  %v2492_v25 = vor.u32 %v2744_v21, %v2491_v20  ;;  %v2424_v14 = vor.u32 %v2725_v6, %v2421_v7  ;;  %v2539_v20 = vld [vmem:[#allocation8 + $0x1c0] sm:$0xf]  ;;  %v2756_v21 = vld [vmem:[#allocation8 + $0x1c4] sm:$0xf0] }
  0xb4   :  { %v2305_v48 = vmul.f32 -1.442695, %v2968_v39  ;;  %v2752_v7 = vld [vmem:[#allocation8 + $0x1a4] sm:$0xf0] }
  0xb5   :  { %v887_v32 = vpop.f32.mrf.mxu2  ;;  %1663 = vmatpush.bf16.msra.mxu2 %v2492_v25  ;;  %v2540_v25 = vor.u32 %v2756_v21, %v2539_v20 }
  0xb6   :  { %2771 = vpow2.f32 %v2305_v48  ;;  %v2760_v48 = vld [vmem:[#allocation8 + $0x1e4] sm:$0xf0] }
  0xb7   :  { %v901_v33 = vpop.f32.mrf.mxu3  ;;  %v861_v36 = vpop.f32.mrf.mxu0  ;;  %1691 = vmatpush.bf16.msrb.mxu0 %v2368_v29  ;;  %v2556_v54 = vor.u32 %v2760_v48, %v2555_v44  ;;  %v2721_v48 = vld [vmem:[#allocation8 + $0xb4] sm:$0xf] }
  0xb8   :  { %v2972_v46 = vadd.f32 %v901_v33, %v887_v32  ;;  %v2563_v32 = vld [vmem:[#allocation8 + $0x1f0] sm:$0xf]  ;;  %v2762_v33 = vld [vmem:[#allocation8 + $0x1f4] sm:$0xf0] }
  0xb9   :  { %v875_v37 = vpop.f32.mrf.mxu1  ;;  %v2564_v35 = vor.u32 %v2762_v33, %v2563_v32 }
  0xba   :  { %v2970_v42 = vadd.f32 %v875_v37, %v861_v36  ;;  %v2306_v57 = vmul.f32 -1.442695, %v2972_v46  ;;  %v2437_v36 = vld [vmem:[#allocation8 + $0xf8] sm:$0xf0]  ;;  %v2483_v37 = vld [vmem:[#allocation8 + $0x150] sm:$0xf] }
  0xbb   :  { %v2440_v40 = vor.u32 %v2729_v34, %v2437_v36  ;;  %1676 = vmatpush.bf16.msra.mxu3 %v2564_v35  ;;  %v2484_v45 = vor.u32 %v2742_v38, %v2483_v37  ;;  %1692 = vmatpush.bf16.msrb.mxu0 %v2360_v47  ;;  %v2416_v34 = vor.u32 %v2723_v26, %v2413_v27  ;;  %v2703_v36 = vld [vmem:[#allocation8 + $0x24] sm:$0xf]  ;;  %v2333_v37 = vld [vmem:[#allocation8 + $0x28] sm:$0xf0] }
  0xbc   :  { %v2309_v53 = vmul.f32 -1.442695, %v2970_v42  ;;  %v2772_v10 = vpop.eup %2771  ;;  %v2532_v47 = vor.u32 %v2754_v43, %v2531_v41 }
  0xbd   :  { %v889_v59 = vpop.f32.mrf.mxu2  ;;  %v2980_v19 = vadd.f32 1.0, %v2772_v10  ;;  %1704 = vmatpush.bf16.msrb.mxu1 %v2440_v40  ;;  %1664 = vmatpush.bf16.msra.mxu2 %v2484_v45  ;;  %v2738_v10 = vld [vmem:[#allocation8 + $0x134] sm:$0xf0]  ;;  %v2336_v40 = vor.u32 %v2703_v36, %v2333_v37 }
  0xbe   :  { %2773 = vpow2.f32 %v2309_v53  ;;  %v2475_v53 = vld [vmem:[#allocation8 + $0x140] sm:$0xf]  ;;  %v2750_v36 = vld [vmem:[#allocation8 + $0x194] sm:$0xf0] }
  0xbf   :  { %v903_v60 = vpop.f32.mrf.mxu3  ;;  %2775 = vpow2.f32 %v2306_v57  ;;  %v2707_v57 = vld [vmem:[#allocation8 + $0x44] sm:$0xf]  ;;  %v2476_v63 = vor.u32 %v2740_v56, %v2475_v53  ;;  %1677 = vmatpush.bf16.msra.mxu3 %v2556_v54  ;;  %v1115_v30 = vand.u32 2147483647, %v2980_v19  ;;  %v1117_v33 = vand.u32 2147483648, %v2980_v19 }
  0xc0   :  { %v2977_v1 = vadd.f32 %v903_v60, %v889_v59  ;;  %v2352_v4 = vor.u32 %v2707_v57, %v2349_v58  ;;  %v2451_v54 = vld [vmem:[#allocation8 + $0x110] sm:$0xf]  ;;  %v2734_v56 = vld [vmem:[#allocation8 + $0x114] sm:$0xf0]  ;;  %vm1111_vm0 = vweird.f32 %v2980_v19 }
  0xc1   :  { %1705 = vmatpush.bf16.msrb.mxu1 %v2432_v62  ;;  %1665 = vmatpush.bf16.msra.mxu2 %v2476_v63  ;;  %v2408_v62 = vor.u32 %v2721_v48, %v2405_v49  ;;  %v2701_v63 = vld [vmem:[#allocation8 + $0x14] sm:$0xf]  ;;  %vm3039_vm1 = vcmp.eq.f32.partialorder %v1115_v30, 8.507059e+37  ;;  %v2317_v30 = vld [vmem:[#allocation8 + $0x8] sm:$0xf0] }
  0xc2   :  { %v2310_v13 = vmul.f32 -1.442695, %v2977_v1  ;;  %1693 = vmatpush.bf16.msrb.mxu0 %v2352_v4  ;;  %v2389_v49 = vld [vmem:[#allocation8 + $0x98] sm:$0xf0] }
  0xc3   :  { %1678 = vmatpush.bf16.msra.mxu3 %v2548_v5  ;;  %v3032_v5 = vor.u32 1.1754944e-38, %v1117_v33 }
  0xc4   :  { %v2774_v15 = vpop.eup %2773  ;;  %2777 = vpow2.f32 %v2310_v13 }
  0xc5   :  { %v2776_v18 = vpop.eup %2775  ;;  %v2982_v23 = vadd.f32 1.0, %v2774_v15  ;;  %2779 = vrcp.f32 %v2980_v19  ;;  %v2468_v15 = vor.u32 %v2738_v10, %v2467_v9  ;;  %1706 = vmatpush.bf16.msrb.mxu1 %v2424_v14  ;;  %v2452_v10 = vor.u32 %v2734_v56, %v2451_v54  ;;  %v2757_v54 = vld [vmem:[#allocation8 + $0x1d4] sm:$0xf]  ;;  %v2549_v56 = vld [vmem:[#allocation8 + $0x1d8] sm:$0xf0] }
  0xc6   :  { %v2984_v51 = vadd.f32 1.0, %v2776_v18  ;;  %1694 = vmatpush.bf16.msrb.mxu0 %v2344_v24  ;;  %v2328_v14 = vor.u32 %v2701_v63, %v2325_v0  ;;  %v2732_v24 = vld [vmem:[#allocation8 + $0x104] sm:$0xf0]  ;;  %v2507_v0 = vld [vmem:[#allocation8 + $0x180] sm:$0xf] }
  0xc7   :  { %2781 = vrcp.f32 %v2982_v23  ;;  %1666 = vmatpush.bf16.msra.mxu2 %v2468_v15  ;;  %1679 = vmatpush.bf16.msra.mxu3 %v2540_v25  ;;  %v1175_v6 = vand.u32 2147483647, %v2982_v23  ;;  %v2524_v15 = vor.u32 %v2752_v7, %v2523_v2  ;;  %v2699_v25 = vld [vmem:[#allocation8 + $0x4] sm:$0xf]  ;;  %vm1171_vm3 = vweird.f32 %v2982_v23 }
  0xc8   :  { %2783 = vrcp.f32 %v2984_v51  ;;  %v2444_v27 = vor.u32 %v2732_v24, %v2443_v17  ;;  %v2320_v33 = vor.u32 %v2699_v25, %v2317_v30  ;;  %v1132_v41 = vand.u32 2147483648, %v2984_v51  ;;  %v2741_v17 = vld [vmem:[#allocation8 + $0x154] sm:$0xf]  ;;  %v2485_v24 = vld [vmem:[#allocation8 + $0x158] sm:$0xf0] }
  0xc9   :  { %1707 = vmatpush.bf16.msrb.mxu1 %v2416_v34  ;;  %vm1126_vm6 = vweird.f32 %v2984_v51  ;;  %vm3075_vm8 = vcmp.eq.f32.partialorder %v1175_v6, 8.507059e+37  ;;  %v2715_v6 = vld [vmem:[#allocation8 + $0x84] sm:$0xf]  ;;  %v2557_v30 = vld [vmem:[#allocation8 + $0x1e8] sm:$0xf0] }
  0xca   :  { %v2778_v50 = vpop.eup %2777  ;;  %1695 = vmatpush.bf16.msrb.mxu0 %v2336_v40  ;;  %v1130_v40 = vand.u32 2147483647, %v2984_v51  ;;  %v2753_v25 = vld [vmem:[#allocation8 + $0x1b4] sm:$0xf] }
  0xcb   :  { %v2990_v59 = vpop.eup %2779  ;;  %v2997_v3 = vadd.f32 1.0, %v2778_v50  ;;  %1680 = vmatpush.bf16.msra.mxu3 %v2532_v47 }
  0xcc   :  { %v1107_v11 = vmul.f32 %v2990_v59, %v2980_v19  ;;  %vm1112_vm2 = vweird.f32 %v2990_v59  ;;  %v2743_v19 = vld [vmem:[#allocation8 + $0x164] sm:$0xf]  ;;  %vm3114_vm13 = vcmp.eq.f32.partialorder %v1130_v40, 8.507059e+37 }
  0xcd   :  { %v2999_v8 = vpop.eup %2781  ;;  %2785 = vrcp.f32 %v2997_v3  ;;  %1708 = vmatpush.bf16.msrb.mxu1 %v2408_v62  ;;  %vm3058_vm5 = vmor %vm1111_vm0, %vm1112_vm2  ;;  %vm1186_vm10 = vweird.f32 %v2997_v3 }
  0xce   :  { %v3008_v22 = vmul.f32 %v2999_v8, %v2982_v23  ;;  %v3011_v29 = vpop.eup %2783  ;;  %v1108_v32 = vsub.f32 1.0, %v1107_v11  ;;  %v2719_v11 = vld [vmem:[#allocation8 + $0xa4] sm:$0xf]  ;;  %1696 = vmatpush.bf16.msrb.mxu0 %v2328_v14  ;;  %vm1172_vm4 = vweird.f32 %v2999_v8 }
  0xcf   :  { %v2986_v28 = vpop.f32.mrf.mxu0  ;;  %v3020_v44 = vmul.f32 %v3011_v29, %v2984_v51  ;;  %1681 = vmatpush.bf16.msra.mxu3 %v2524_v15  ;;  %vm3071_vm7 = vmor %vm1171_vm3, %vm1172_vm4  ;;  %vm1127_vm9 = vweird.f32 %v3011_v29  ;;  %v2552_v51 = vor.u32 %v2757_v54, %v2549_v56 }
  0xd0   :  { %v1168_v45 = vsub.f32 1.0, %v3008_v22  ;;  %v1109_v4 = vmul.f32 %v2990_v59, %v1108_v32  ;;  %v2400_v22 = vor.u32 %v2719_v11, %v2397_v16  ;;  %v2761_v11 = vld [vmem:[#allocation8 + $0x1f4] sm:$0xf]  ;;  %v2565_v16 = vld [vmem:[#allocation8 + $0x1f8] sm:$0xf0]  ;;  %vm3103_vm12 = vmor %vm1126_vm6, %vm1127_vm9 }
  0xd1   :  { %v929_v55 = vpop.f32.mrf.mxu1  ;;  %v1123_v9 = vsub.f32 1.0, %v3020_v44 }
  0xd2   :  { %v3004_v18 = vadd.f32 %v929_v55, %v2986_v28  ;;  %v2459_v55 = vld [vmem:[#allocation8 + $0x120] sm:$0xf]  ;;  %v1169_v20 = vmul.f32 %v2999_v8, %v1168_v45  ;;  %v3049_v26 = vadd.f32 %v2990_v59, %v1109_v4  ;;  %v2717_v45 = vld [vmem:[#allocation8 + $0x94] sm:$0xf]  ;;  %1709 = vmatpush.bf16.msrb.mxu1 %v2400_v22  ;;  %1697 = vmatpush.bf16.msrb.mxu0 %v2320_v33  ;;  %v2748_v4 = vld [vmem:[#allocation8 + $0x184] sm:$0xf0] }
  0xd3   :  { %v2460_v35 = vor.u32 %v2736_v31, %v2459_v55  ;;  %v3024_v57 = vpop.eup %2785  ;;  %v2745_v55 = vld [vmem:[#allocation8 + $0x174] sm:$0xf]  ;;  %v2501_v31 = vld [vmem:[#allocation8 + $0x178] sm:$0xf0]  ;;  %v2508_v15 = vor.u32 %v2748_v4, %v2507_v0  ;;  %v2568_v22 = vor.u32 %v2761_v11, %v2565_v16 }
  0xd4   :  { %v2307_v38 = vmul.f32 -1.442695, %v3004_v18  ;;  %v2504_v34 = vor.u32 %v2745_v55, %v2501_v31  ;;  %v1170_v47 = vadd.f32 %v2999_v8, %v1169_v20  ;;  %v1114_v2 = vsel %vm3058_vm5, %v2990_v59, %v3049_v26  ;;  %v2469_v0 = vld [vmem:[#allocation8 + $0x138] sm:$0xf0] }
  0xd5   :  { %v2993_v60 = vpop.f32.mrf.mxu2  ;;  %1667 = vmatpush.bf16.msra.mxu2 %v2460_v35  ;;  %v2515_v35 = vld [vmem:[#allocation8 + $0x190] sm:$0xf]  ;;  %vm1187_vm11 = vweird.f32 %v3024_v57  ;;  %v2488_v26 = vor.u32 %v2741_v17, %v2485_v24  ;;  %v2735_v17 = vld [vmem:[#allocation8 + $0x124] sm:$0xf] }
  0xd6   :  { %2787 = vpow2.f32 %v2307_v38  ;;  %v2516_v44 = vor.u32 %v2750_v36, %v2515_v35  ;;  %v1174_v59 = vsel %vm3071_vm7, %v2999_v8, %v1170_v47  ;;  %v1119_v8 = vsel %vm3039_vm1, %v3032_v5, %v1114_v2  ;;  %vm3122_vm14 = vmor %vm1186_vm10, %vm1187_vm11  ;;  %v2525_v36 = vld [vmem:[#allocation8 + $0x1a8] sm:$0xf0] }
  0xd7   :  { %v2995_v61 = vpop.f32.mrf.mxu3  ;;  %v917_v12 = vpop.f32.mrf.mxu0  ;;  %v1226_v40 = vmul.f32 %v1119_v8, %v2968_v39 }
  0xd8   :  { %v3029_v58 = vadd.f32 %v2995_v61, %v2993_v60  ;;  %v1177_v60 = vand.u32 2147483648, %v2982_v23  ;;  %1682 = vmatpush.bf16.msra.mxu3 %v2516_v44  ;;  %v2739_v44 = vld [vmem:[#allocation8 + $0x144] sm:$0xf] }
  0xd9   :  { %v931_v13 = vpop.f32.mrf.mxu1  ;;  %1668 = vmatpush.bf16.msra.mxu2 %v2452_v10  ;;  %v2381_v10 = vld [vmem:[#allocation8 + $0x88] sm:$0xf0] }
  0xda   :  { %v3014_v28 = vadd.f32 %v931_v13, %v917_v12  ;;  %v1182_v13 = vmul.f32 %v3024_v57, %v2997_v3  ;;  %v2308_v21 = vmul.f32 -1.442695, %v3029_v58  ;;  %v1178_v62 = vor.u32 1.1754944e-38, %v1177_v60 }
  0xdb   :  { %v1190_v12 = vand.u32 2147483647, %v2997_v3 }
  0xdc   :  { %v2311_v50 = vmul.f32 -1.442695, %v3014_v28  ;;  %v2788_v37 = vpop.eup %2787  ;;  %v1183_v43 = vsub.f32 1.0, %v1182_v13  ;;  %v1192_v13 = vand.u32 2147483648, %v2997_v3  ;;  %1683 = vmatpush.bf16.msra.mxu3 %v2508_v15  ;;  %v1179_v31 = vsel %vm3075_vm8, %v1178_v62, %v1174_v59 }
  0xdd   :  { %v945_v52 = vpop.f32.mrf.mxu2  ;;  %1669 = vmatpush.bf16.msra.mxu2 %v2444_v27  ;;  %v3084_v23 = vadd.f32 1.0, %v2788_v37  ;;  %v2759_v27 = vld [vmem:[#allocation8 + $0x1e4] sm:$0xf]  ;;  %v1133_v3 = vor.u32 1.1754944e-38, %v1132_v41  ;;  %vm1191_vm15 = vcmp.eq.f32.partialorder %v1190_v12, 8.507059e+37 }
  0xde   :  { %2789 = vpow2.f32 %v2311_v50  ;;  %v2493_v50 = vld [vmem:[#allocation8 + $0x168] sm:$0xf0]  ;;  %v1184_v7 = vmul.f32 %v3024_v57, %v1183_v43  ;;  %v2560_v33 = vor.u32 %v2759_v27, %v2557_v30  ;;  %v2453_v12 = vld [vmem:[#allocation8 + $0x118] sm:$0xf0] }
  0xdf   :  { %v959_v53 = vpop.f32.mrf.mxu3  ;;  %2791 = vpow2.f32 %v2308_v21  ;;  %v2496_v60 = vor.u32 %v2743_v19, %v2493_v50  ;;  %v2384_v21 = vor.u32 %v2715_v6, %v2381_v10  ;;  %v1230_v50 = vmul.f32 %v1179_v31, %v2970_v42  ;;  %v2737_v42 = vld [vmem:[#allocation8 + $0x134] sm:$0xf] }
  0xe0   :  { %v3037_v61 = vadd.f32 %v959_v53, %v945_v52  ;;  %v1124_v53 = vmul.f32 %v3011_v29, %v1123_v9  ;;  %v2392_v9 = vor.u32 %v2717_v45, %v2389_v49  ;;  %v1185_v5 = vadd.f32 %v3024_v57, %v1184_v7  ;;  %1732 = vmatpush.bf16.msrb.mxu3 %v2568_v22  ;;  %v2477_v45 = vld [vmem:[#allocation8 + $0x148] sm:$0xf0] }
  0xe1   :  { %1718 = vmatpush.bf16.msrb.mxu2 %v2504_v34  ;;  %v1193_v49 = vor.u32 1.1754944e-38, %v1192_v13  ;;  %v2472_v4 = vor.u32 %v2737_v42, %v2469_v0  ;;  %vm1141_vm0 = vweird.f32 %v3084_v23  ;;  %v2747_v0 = vld [vmem:[#allocation8 + $0x184] sm:$0xf] }
  0xe2   :  { %v2312_v32 = vmul.f32 -1.442695, %v3037_v61  ;;  %v1125_v20 = vadd.f32 %v3011_v29, %v1124_v53  ;;  %1710 = vmatpush.bf16.msrb.mxu1 %v2392_v9  ;;  %v2480_v53 = vor.u32 %v2739_v44, %v2477_v45  ;;  %v1189_v39 = vsel %vm3122_vm14, %v3024_v57, %v1185_v5  ;;  %v2755_v9 = vld [vmem:[#allocation8 + $0x1c4] sm:$0xf]  ;;  %v2733_v5 = vld [vmem:[#allocation8 + $0x114] sm:$0xf] }
  0xe3   :  { %v1194_v7 = vsel %vm1191_vm15, %v1193_v49, %v1189_v39  ;;  %v2456_v35 = vor.u32 %v2733_v5, %v2453_v12 }
  0xe4   :  { %v2790_v52 = vpop.eup %2789  ;;  %2793 = vpow2.f32 %v2312_v32  ;;  %v1129_v47 = vsel %vm3103_vm12, %v3011_v29, %v1125_v20  ;;  %1733 = vmatpush.bf16.msrb.mxu3 %v2560_v33  ;;  %v2461_v20 = vld [vmem:[#allocation8 + $0x128] sm:$0xf0] }
  0xe5   :  { %v3092_v14 = vadd.f32 1.0, %v2790_v52  ;;  %1719 = vmatpush.bf16.msrb.mxu2 %v2496_v60  ;;  %2795 = vrcp.f32 %v3084_v23  ;;  %v2792_v55 = vpop.eup %2791  ;;  %v1134_v2 = vsel %vm3114_vm13, %v1133_v3, %v1129_v47  ;;  %v2541_v60 = vld [vmem:[#allocation8 + $0x1c8] sm:$0xf0]  ;;  %v2464_v8 = vor.u32 %v2735_v17, %v2461_v20  ;;  %v2749_v47 = vld [vmem:[#allocation8 + $0x194] sm:$0xf] }
  0xe6   :  { %1711 = vmatpush.bf16.msrb.mxu1 %v2384_v21  ;;  %v2544_v13 = vor.u32 %v2755_v9, %v2541_v60  ;;  %v1227_v15 = vmul.f32 %v1134_v2, %v2972_v46  ;;  %v1231_v21 = vmul.f32 %v1194_v7, %v2977_v1  ;;  %v2517_v3 = vld [vmem:[#allocation8 + $0x198] sm:$0xf0]  ;;  %v2509_v2 = vld [vmem:[#allocation8 + $0x188] sm:$0xf0] }
  0xe7   :  { %2797 = vrcp.f32 %v3092_v14  ;;  %vm1201_vm2 = vweird.f32 %v3092_v14  ;;  %v1207_v39 = vand.u32 2147483648, %v3092_v14 }
  0xe8   :  { %1734 = vmatpush.bf16.msrb.mxu3 %v2552_v51 }
  0xe9   :  { %1720 = vmatpush.bf16.msrb.mxu2 %v2488_v26  ;;  %v2533_v26 = vld [vmem:[#allocation8 + $0x1b8] sm:$0xf0] }
  0xea   :  { %v2794_v34 = vpop.eup %2793  ;;  %v2536_v46 = vor.u32 %v2753_v25, %v2533_v26 }
  0xeb   :  { %v3139_v29 = vadd.f32 1.0, %v2794_v34  ;;  %v3141_v41 = vpop.eup %2795 }
  0xec   :  { %v1137_v10 = vmul.f32 %v3141_v41, %v3084_v23  ;;  %1735 = vmatpush.bf16.msrb.mxu3 %v2544_v13  ;;  %vm1142_vm1 = vweird.f32 %v3141_v41  ;;  %v1208_v13 = vor.u32 1.1754944e-38, %v1207_v39 }
  0xed   :  { %1721 = vmatpush.bf16.msrb.mxu2 %v2480_v53  ;;  %v3145_v6 = vpop.eup %2797  ;;  %v2520_v53 = vor.u32 %v2749_v47, %v2517_v3  ;;  %vm3179_vm4 = vmor %vm1141_vm0, %vm1142_vm1  ;;  %vm1216_vm10 = vweird.f32 %v3139_v29  ;;  %v1222_v17 = vand.u32 2147483648, %v3139_v29 }
  0xee   :  { %v1197_v22 = vmul.f32 %v3145_v6, %v3092_v14  ;;  %v1138_v27 = vsub.f32 1.0, %v1137_v10  ;;  %vm1202_vm3 = vweird.f32 %v3145_v6  ;;  %v2512_v10 = vor.u32 %v2747_v0, %v2509_v2 }
  0xef   :  { %v971_v48 = vpop.f32.mrf.mxu0  ;;  %vm3187_vm5 = vmor %vm1201_vm2, %vm1202_vm3  ;;  %v1223_v12 = vor.u32 1.1754944e-38, %v1222_v17 }
  0xf0   :  { %v1198_v1 = vsub.f32 1.0, %v1197_v22  ;;  %1736 = vmatpush.bf16.msrb.mxu3 %v2536_v46  ;;  %v1139_v44 = vmul.f32 %v3141_v41, %v1138_v27 }
  0xf1   :  { %v985_v63 = vpop.f32.mrf.mxu1  ;;  %1722 = vmatpush.bf16.msrb.mxu2 %v2472_v4 }
  0xf2   :  { %v986_v37 = vadd.f32 %v985_v63, %v971_v48  ;;  %v3134_v48 = vadd.f32 1.0, %v2792_v55  ;;  %v1199_v49 = vmul.f32 %v3145_v6, %v1198_v1  ;;  %v1140_v54 = vadd.f32 %v3141_v41, %v1139_v44 }
  0xf4   :  { %v1234_v62 = vmul.f32 %v1226_v40, %v986_v37  ;;  %2799 = vrcp.f32 %v3134_v48  ;;  %v2731_v37 = vld [vmem:[#allocation8 + $0x104] sm:$0xf]  ;;  %vm1156_vm7 = vweird.f32 %v3134_v48 }
  0xf5   :  { %v999_v32 = vpop.f32.mrf.mxu2  ;;  %2801 = vrcp.f32 %v3139_v29  ;;  %1723 = vmatpush.bf16.msrb.mxu2 %v2464_v8 }
  0xf7   :  { %v1013_v38 = vpop.f32.mrf.mxu3  ;;  %v973_v43 = vpop.f32.mrf.mxu0 }
  0xf8   :  { %v1014_v11 = vadd.f32 %v1013_v38, %v999_v32  ;;  %v2751_v32 = vld [vmem:[#allocation8 + $0x1a4] sm:$0xf]  ;;  %v2445_v38 = vld [vmem:[#allocation8 + $0x108] sm:$0xf0] }
  0xf9   :  { %v987_v19 = vpop.f32.mrf.mxu1  ;;  %1724 = vmatpush.bf16.msrb.mxu2 %v2456_v35 }
  0xfa   :  { %v988_v52 = vadd.f32 %v987_v19, %v973_v43  ;;  %v1235_v30 = vmul.f32 %v1227_v15, %v1014_v11  ;;  %v3158_v31 = vpop.eup %2799  ;;  %v2528_v43 = vor.u32 %v2751_v32, %v2525_v36  ;;  %v2448_v19 = vor.u32 %v2731_v37, %v2445_v38 }
  0xfb   :  { %v3160_v33 = vpop.eup %2801  ;;  %v1152_v45 = vmul.f32 %v3158_v31, %v3134_v48  ;;  %v1144_v11 = vsel %vm3179_vm4, %v3141_v41, %v1140_v54  ;;  %vm1157_vm8 = vweird.f32 %v3158_v31 }
  0xfc   :  { %v1238_v63 = vmul.f32 %v1230_v50, %v988_v52  ;;  %v1212_v40 = vmul.f32 %v3160_v33, %v3139_v29  ;;  %v1145_v50 = vand.u32 2147483647, %v3084_v23  ;;  %v1147_v52 = vand.u32 2147483648, %v3084_v23  ;;  %1737 = vmatpush.bf16.msrb.mxu3 %v2528_v43  ;;  %vm3214_vm12 = vmor %vm1156_vm7, %vm1157_vm8 }
  0xfd   :  { %v1001_v59 = vpop.f32.mrf.mxu2  ;;  %v1153_v56 = vsub.f32 1.0, %v1152_v45  ;;  %v1205_v23 = vand.u32 2147483647, %v3092_v14  ;;  %1725 = vmatpush.bf16.msrb.mxu2 %v2448_v19  ;;  %vm1217_vm11 = vweird.f32 %v3160_v33 }
  0xfe   :  { %v3148_v57 = vpack.c.bf16 %v1238_v63, %v1234_v62  ;;  %v1213_v51 = vsub.f32 1.0, %v1212_v40  ;;  %v1200_v63 = vadd.f32 %v3145_v6, %v1199_v49  ;;  %vm3191_vm6 = vcmp.eq.f32.partialorder %v1145_v50, 8.507059e+37  ;;  %vm3220_vm13 = vmor %vm1216_vm10, %vm1217_vm11 }
  0xff   :  { %v1015_v16 = vpop.f32.mrf.mxu3  ;;  %v1148_v60 = vor.u32 1.1754944e-38, %v1147_v52  ;;  %vm1206_vm9 = vcmp.eq.f32.partialorder %v1205_v23, 8.507059e+37 }
 0x100   :  { %1642 = vmatmul.bf16.vlgmr.msra.gmra.mxu0 %v3148_v57  ;;  %v1016_v24 = vadd.f32 %v1015_v16, %v1001_v59  ;;  %1738 = vmatpush.bf16.msrb.mxu3 %v2520_v53  ;;  %v1154_v59 = vmul.f32 %v3158_v31, %v1153_v56  ;;  %v1214_v14 = vmul.f32 %v3160_v33, %v1213_v51  ;;  %v1162_v16 = vand.u32 2147483648, %v3134_v48 }
 0x101   :  { %v1204_v15 = vsel %vm3187_vm5, %v3145_v6, %v1200_v63  ;;  %v1149_v41 = vsel %vm3191_vm6, %v1148_v60, %v1144_v11 }
 0x102   :  { %v1239_v55 = vmul.f32 %v1231_v21, %v1016_v24  ;;  %v1155_v20 = vadd.f32 %v3158_v31, %v1154_v59  ;;  %v1209_v6 = vsel %vm1206_vm9, %v1208_v13, %v1204_v15  ;;  %v1215_v22 = vadd.f32 %v3160_v33, %v1214_v14 }
 0x103   :  { %v1220_v24 = vand.u32 2147483647, %v3139_v29  ;;  %v1228_v46 = vmul.f32 %v1149_v41, %v3004_v18  ;;  %v1232_v5 = vmul.f32 %v1209_v6, %v3014_v28 }
 0x104   :  { %v3162_v34 = vpack.c.bf16 %v1239_v55, %v1235_v30  ;;  %1739 = vmatpush.bf16.msrb.mxu3 %v2512_v10  ;;  %v1163_v30 = vor.u32 1.1754944e-38, %v1162_v16  ;;  %v1159_v29 = vsel %vm3214_vm12, %v3158_v31, %v1155_v20  ;;  %v1219_v1 = vsel %vm3220_vm13, %v3160_v33, %v1215_v22 }
 0x105   :  { %vm1221_vm15 = vcmp.eq.f32.partialorder %v1220_v24, 8.507059e+37 }
 0x106   :  { %1656 = vmatmul.bf16.vlgmr.msra.gmra.mxu1 %v3162_v34  ;;  %v1224_v18 = vsel %vm1221_vm15, %v1223_v12, %v1219_v1 }
 0x107   :  { %v1233_v45 = vmul.f32 %v1224_v18, %v3037_v61 }
 0x10f   :  { %v1027_v42 = vpop.f32.mrf.mxu0 }
 0x110   :  { %1698 = vmatmul.bf16.vlgmr.msrb.gmra.mxu0 %v3148_v57  ;;  %v1160_v57 = vand.u32 2147483647, %v3134_v48 }
 0x111   :  { %v1041_v7 = vpop.f32.mrf.mxu1 }
 0x112   :  { %v1042_v48 = vadd.f32 %v1041_v7, %v1027_v42  ;;  %vm1161_vm14 = vcmp.eq.f32.partialorder %v1160_v57, 8.507059e+37 }
 0x113   :  { %v1164_v37 = vsel %vm1161_vm14, %v1163_v30, %v1159_v29 }
 0x114   :  { %v1236_v35 = vmul.f32 %v1228_v46, %v1042_v48 }
 0x115   :  { %v1055_v8 = vpop.f32.mrf.mxu2 }
 0x116   :  { %1712 = vmatmul.bf16.vlgmr.msrb.gmra.mxu1 %v3162_v34  ;;  %v1229_v34 = vmul.f32 %v1164_v37, %v3029_v58 }
 0x117   :  { %v1069_v26 = vpop.f32.mrf.mxu3  ;;  %v1029_v27 = vpop.f32.mrf.mxu0 }
 0x118   :  { %v1070_v28 = vadd.f32 %v1069_v26, %v1055_v8 }
 0x119   :  { %v1043_v55 = vpop.f32.mrf.mxu1 }
 0x11a   :  { %v1044_v32 = vadd.f32 %v1043_v55, %v1029_v27  ;;  %v1237_v40 = vmul.f32 %v1229_v34, %v1070_v28 }
 0x11c   :  { %v1240_v36 = vmul.f32 %v1232_v5, %v1044_v32 }
 0x11d   :  { %v1057_v43 = vpop.f32.mrf.mxu2 }
 0x11e   :  { %v1248_v38 = vpack.c.bf16 %v1240_v36, %v1236_v35 }
 0x11f   :  { %v1071_v44 = vpop.f32.mrf.mxu3 }
 0x120   :  { %1670 = vmatmul.bf16.vlgmr.msra.gmra.mxu2 %v1248_v38  ;;  %v1072_v31 = vadd.f32 %v1071_v44, %v1057_v43 }
 0x122   :  { %v1241_v47 = vmul.f32 %v1233_v45, %v1072_v31 }
 0x124   :  { %v1249_v3 = vpack.c.bf16 %v1241_v47, %v1237_v40 }
 0x126   :  { %1684 = vmatmul.bf16.vlgmr.msra.gmra.mxu3 %v1249_v3 }
 0x130   :  { %1726 = vmatmul.bf16.vlgmr.msrb.gmra.mxu2 %v1248_v38 }
 0x136   :  { %1740 = vmatmul.bf16.vlgmr.msrb.gmra.mxu3 %v1249_v3 }
 0x17d   :  { %v1643_v49 = vpop.f32.mrf.mxu0 }
 0x183   :  { %v1657_v33 = vpop.f32.mrf.mxu1 }
 0x184   :  { %v1658_v62 = vadd.f32 %v1657_v33, %v1643_v49 }
 0x185   :  { %v1645_v52 = vpop.f32.mrf.mxu0 }
 0x18b   :  { %v1659_v50 = vpop.f32.mrf.mxu1 }
 0x18c   :  { %v1660_v10 = vadd.f32 %v1659_v50, %v1645_v52 }
 0x18d   :  { %v1699_v51 = vpop.f32.mrf.mxu0 }
 0x193   :  { %v1713_v56 = vpop.f32.mrf.mxu1 }
 0x194   :  { %v1714_v61 = vadd.f32 %v1713_v56, %v1699_v51 }
 0x195   :  { %v1701_v9 = vpop.f32.mrf.mxu0 }
 0x19b   :  { %v1715_v4 = vpop.f32.mrf.mxu1 }
 0x19c   :  { %v1716_v11 = vadd.f32 %v1715_v4, %v1701_v9 }
 0x1a3   :  { %v1671_v19 = vpop.f32.mrf.mxu2 }
 0x1a4   :  { %v1672_v63 = vadd.f32 %v1671_v19, %v1658_v62 }
 0x1a9   :  { %v1685_v53 = vpop.f32.mrf.mxu3 }
 0x1aa   :  { %v1686_v0 = vadd.f32 %v1685_v53, %v1672_v63 }
 0x1ab   :  { %v1673_v54 = vpop.f32.mrf.mxu2 }
 0x1ac   :  { %v1674_v59 = vadd.f32 %v1673_v54, %v1660_v10 }
 0x1b1   :  { %v1687_v39 = vpop.f32.mrf.mxu3 }
 0x1b2   :  { %v1688_v15 = vadd.f32 %v1687_v39, %v1674_v59 }
 0x1b3   :  { %v1727_v58 = vpop.f32.mrf.mxu2 }
 0x1b4   :  { %v1728_v23 = vadd.f32 %v1727_v58, %v1714_v61 }
 0x1b9   :  { %v1741_v42 = vpop.f32.mrf.mxu3 }
 0x1ba   :  { %v1742_v2 = vadd.f32 %v1741_v42, %v1728_v23 }
 0x1bb   :  { %v1729_v60 = vpop.f32.mrf.mxu2 }
 0x1bc   :  { %v1761_v7 = vpack.c.bf16 %v1742_v2, %v1686_v0  ;;  %v1730_v13 = vadd.f32 %v1729_v60, %v1716_v11 }
 0x1be   :  { %1763 = vst [vmem:[#allocation9] sm:$0xff] %v1761_v7 }
 0x1c1   :  { %v1743_v14 = vpop.f32.mrf.mxu3 }
 0x1c2   :  { %v1744_v16 = vadd.f32 %v1743_v14, %v1730_v13 }
 0x1c4   :  { %v1762_v41 = vpack.c.bf16 %v1744_v16, %v1688_v15 }
 0x1c6   :  { %1764 = vst [vmem:[#allocation9 + $0x8] sm:$0xff] %v1762_v41 }
 0x1c7   :  { %1777 = dma.vmem_to_hbm [thread:$0]  %s1770_s29, 256, %s1772_s5, [#allocation5], %s2909_s24, %s2909_s24, %s2910_s25  }
 0x1c8   :  { %2903 = dma.done.wait [#allocation5], 256  }
 0x1c9   :  { %2904 = vsyncadd [#allocation5], 4294967040 }
 0x1ca   :  { %1782 = vsyncpa [#allocation4], 1 }
 0x1cb   :  { %1783 = vsyncpa [#allocation7], 1 }
 0x1cc   :  { %1784 = vsyncpa [#allocation5], 1 }

</bundles_post_ra>
